<compile_context>
chip_gen: v7x
topology: tpu7x:2x2x1
jax: 0.10.0
libtpu: 0.0.40
codegen_flags: <defaults>
</compile_context>

<pallas_src>
import numpy as np

import jax
import jax.numpy as jnp
from jax.experimental import pallas as pl
from jax.experimental.pallas import tpu as pltpu

# bf16 doubles MXU throughput on v6e/v7x and is the native-rate path on v5e;
# accumulation stays f32.  Set to jnp.float32 for bit-faithful f32 forward.
MXU_INPUT_DTYPE = jnp.bfloat16


def _round_up(x, m):
    return (x + m - 1) // m * m


def _resident_spec(arr):
    """Whole-array block + constant index_map: DMA'd once at grid step 0, then
    resident in VMEM (Pallas skips copies when the block index is unchanged)."""
    nd = arr.ndim
    return pl.BlockSpec(arr.shape, lambda n, _nd=nd: (0,) * _nd)


# ----------------------------------------------------------------------------
# Fused whole-network kernel (one sample per grid step)
# ----------------------------------------------------------------------------
def _make_fused_kernel(cfgs, K, dt):
    nb = len(cfgs)

    # ref order: xe, xo, [w1_i, wds_i, w2_i, ch_i] * nb, sel_j * (nb-1),
    #            regw, regb, out, pad_scratch_i * nb
    def kernel(*refs):
        f32 = jnp.float32
        xe_ref, xo_ref = refs[0], refs[1]
        regw_ref = refs[5 * nb + 1]
        regb_ref = refs[5 * nb + 2]
        out_ref = refs[5 * nb + 3]

        act = None   # current block output, f32 (Cout, L2)
        cur = None   # even-decimated activation feeding the next block, dt

        for i, cfg in enumerate(cfgs):
            w1_ref, wds_ref, w2_ref, ch_ref = refs[2 + 4 * i: 6 + 4 * i]
            pad_ref = refs[5 * nb + 4 + i]
            d, L1, L2, pad_l = cfg["d"], cfg["L1"], cfg["L2"], cfg["pad_l"]

            # ---- conv1: kernel K, stride 2, dilation d, no padding ----------
            if i == 0:
                # xe/xo are the stride-2 de-interleave of the raw input, so
                # every tap is a contiguous slice.  The K taps are stacked
                # along the contraction dim -> ONE depth-(K*Cin) MXU matmul.
                xe = xe_ref[...]                       # (Cin, L/2) = x[:, 0::2]
                xo = xo_ref[...]                       # (Cin, L/2) = x[:, 1::2]
                taps = []
                for t in range(K):
                    off = d * t
                    src = xe if off % 2 == 0 else xo
                    taps.append(src[:, off // 2: off // 2 + L1])
                rhs = jnp.concatenate(taps, axis=0).astype(dt)   # (K*Cin, L1)
                y1 = jnp.dot(w1_ref[...], rhs, preferred_element_type=f32)
                res_in = xe.astype(dt)                 # residual input, cast once
            else:
                # dilation d = 2**i is even -> conv1 only touches the even
                # positions of the previous activation, which is exactly `cur`.
                y1 = None
                for t in range(K):
                    tap = cur[:, (d // 2) * t: (d // 2) * t + L1]
                    c = jnp.dot(w1_ref[t], tap, preferred_element_type=f32)
                    y1 = c if y1 is None else y1 + c
                res_in = cur
            h = jnp.maximum(y1 + ch_ref[0], 0.0)       # bias + relu1 (dropout1 = id)

            # ---- residual path: 1x1 conv, stride 2 --------------------------
            res = jnp.dot(wds_ref[...], res_in[:, :L2],
                          preferred_element_type=f32) + ch_ref[1]

            # ---- F.pad(h, (0, 2**i)) + conv2 (stride 1, pad, dilation d) ----
            # Lane-aligned VMEM scratch: zero it, place h at column pad_l, then
            # each dilated tap is a plain static slice (no concatenate/relayout).
            pad_ref[...] = jnp.zeros_like(pad_ref)
            pad_ref[:, pad_l: pad_l + L1] = h.astype(dt)
            y2 = None
            for t in range(K):
                tap = pad_ref[:, d * t: d * t + L2]
                c = jnp.dot(w2_ref[t], tap, preferred_element_type=f32)
                y2 = c if y2 is None else y2 + c
            y2 = jnp.maximum(y2 + ch_ref[2], 0.0)      # bias + relu2 (dropout2 = id)

            # ---- + residual, BatchNorm1d (eval, folded affine), ReLU --------
            act = jnp.maximum((y2 + res) * ch_ref[3] + ch_ref[4], 0.0)  # (Cout, L2)

            if i + 1 < nb:
                # act[:, 0::2] done as a 0/1 selection matmul on the (idle) MXU
                # instead of a strided lane gather; result cast once to dt.
                sel_ref = refs[2 + 4 * nb + i]
                cur = jnp.dot(act.astype(dt), sel_ref[...],
                              preferred_element_type=f32).astype(dt)

        # ---- nn.Flatten + nn.Linear(Cout*L2, 1), fused ----------------------
        per_ch = jnp.sum(act * regw_ref[...], axis=1, keepdims=True)   # lane reduce
        tot = jnp.sum(per_ch, axis=0, keepdims=True) + regb_ref[...]   # (1, 1)
        out_ref[...] = jnp.broadcast_to(tot, (1, 128))                 # lane-dense

    return kernel


# ----------------------------------------------------------------------------
# One-time parameter preprocessing (kept OUT of the jitted forward)
# ----------------------------------------------------------------------------
def weight_norm_weight(v, g):
    """torch.nn.utils.weight_norm (dim=0): W = g * v / ||v||_{per out-channel}."""
    norm = jnp.sqrt(jnp.sum(v * v, axis=(1, 2), keepdims=True))
    return g.reshape(-1, 1, 1) * v / norm


def prepare_params(params, input_length, dtype=MXU_INPUT_DTYPE):
    blocks = params["blocks"]
    nb = len(blocks)
    w1_l, wds_l, w2_l, ch_l, sel_l = [], [], [], [], []
    Lin = input_length
    for i, p in enumerate(blocks):
        d = 2 ** i
        w1 = weight_norm_weight(p["v1"], p["g1"])          # (Cout, Cin, K)
        w2 = weight_norm_weight(p["v2"], p["g2"])          # (Cout, Cout, K)
        cout, cin, K = w1.shape
        if i == 0:
            # taps folded into one contraction: row order = t*Cin + c
            w1p = jnp.transpose(w1, (0, 2, 1)).reshape(cout, K * cin)
        else:
            w1p = jnp.transpose(w1, (2, 0, 1))              # (K, Cout, Cin) tap-major
        w1_l.append(w1p.astype(dtype))
        wds_l.append(p["wds"].reshape(cout, cin).astype(dtype))
        w2_l.append(jnp.transpose(w2, (2, 0, 1)).astype(dtype))
        gamma = p["bn_w"] / jnp.sqrt(p["bn_var"] + 1e-5)    # eval-mode BN fold
        beta = p["bn_b"] - p["bn_mean"] * gamma
        ch_l.append(jnp.stack([p["b1"], p["bds"], p["b2"], gamma, beta],
                              axis=0).reshape(5, cout, 1).astype(jnp.float32))
        L1 = (Lin - (d * (K - 1) + 1)) // 2 + 1
        pad_l = (d * (K - 1)) // 2
        L2 = L1 + 2 * pad_l + 2 ** i - d * (K - 1)
        if i + 1 < nb:
            # 0/1 matrix selecting even positions: sel[2m, m] = 1
            sel = (jnp.arange(L2)[:, None] == 2 * jnp.arange(L2 // 2)[None, :])
            sel_l.append(sel.astype(dtype))
        Lin = L2
    c_last = blocks[-1]["b1"].shape[0]
    assert params["reg_w"].size == c_last * Lin, (c_last, Lin)
    regw = params["reg_w"].reshape(c_last, Lin).astype(jnp.float32)   # (c, l) order
    regb = params["reg_b"].reshape(1, 1).astype(jnp.float32)
    return dict(w1=w1_l, wds=wds_l, w2=w2_l, ch=ch_l, sel=sel_l,
                regw=regw, regb=regb)


# ----------------------------------------------------------------------------
# Jitted forward: two strided slices + ONE pallas_call
# ----------------------------------------------------------------------------
def temporal_conv_net_forward(x, pp):
    N, C, L = x.shape
    nb = len(pp["w1"])
    K = pp["w2"][0].shape[0]
    dt = pp["w2"][0].dtype
    assert L % 2 == 0

    # static per-block geometry (derived from static shapes)
    cfgs = []
    Lin = L
    for i in range(nb):
        d = 2 ** i
        cout, cin = pp["wds"][i].shape
        L1 = (Lin - (d * (K - 1) + 1)) // 2 + 1             # conv1 out length
        pad_l = (d * (K - 1)) // 2                          # conv2 symmetric pad
        pad_r = pad_l + 2 ** i                              # + F.pad(out, (0, 2**i))
        L2 = L1 + pad_l + pad_r - d * (K - 1)               # conv2 out length
        assert L2 == Lin // 2                               # residual add needs this
        scr_w = _round_up(pad_l + L1 + pad_r, 128)          # lane-aligned scratch
        cfgs.append(dict(d=d, cin=cin, cout=cout, L1=L1, L2=L2,
                         pad_l=pad_l, scr_w=scr_w))
        Lin = L2
    c_last, l_last = cfgs[-1]["cout"], cfgs[-1]["L2"]
    assert pp["regw"].shape == (c_last, l_last)

    # stride-2 de-interleave of the raw input (tiny, read once) so every conv1
    # tap inside the kernel is a contiguous slice
    xe = x[:, :, 0::2]
    xo = x[:, :, 1::2]
    Lh = L // 2

    kernel = _make_fused_kernel(cfgs, K, dt)

    in_specs = [pl.BlockSpec((None, C, Lh), lambda n: (n, 0, 0)),
                pl.BlockSpec((None, C, Lh), lambda n: (n, 0, 0))]
    args = [xe, xo]
    for i in range(nb):
        for a in (pp["w1"][i], pp["wds"][i], pp["w2"][i], pp["ch"][i]):
            in_specs.append(_resident_spec(a))
            args.append(a)
    for s in pp["sel"]:
        in_specs.append(_resident_spec(s))
        args.append(s)
    for a in (pp["regw"], pp["regb"]):
        in_specs.append(_resident_spec(a))
        args.append(a)

    scratch_shapes = [pltpu.VMEM((cfg["cout"], cfg["scr_w"]), dt) for cfg in cfgs]

    flops = 0
    for i, cfg in enumerate(cfgs):
        flops += 2 * cfg["cout"] * cfg["cin"] * K * cfg["L1"]        # conv1
        flops += 2 * cfg["cout"] * cfg["cin"] * cfg["L2"]            # 1x1 downsample
        flops += 2 * cfg["cout"] * cfg["cout"] * K * cfg["L2"]       # conv2
        if i + 1 < nb:
            flops += 2 * cfg["cout"] * cfg["L2"] * (cfg["L2"] // 2)  # decimation
    flops = N * (flops + 2 * c_last * l_last)                        # + regressor
    bytes_accessed = sum(int(a.size) * a.dtype.itemsize for a in args) + N * 128 * 4

    y = pl.pallas_call(
        kernel,
        out_shape=jax.ShapeDtypeStruct((N, 1, 128), jnp.float32),
        grid=(N,),                       # one sample per step; "parallel" keeps
        in_specs=in_specs,               # both v7x TensorCores busy (no-op on
        out_specs=pl.BlockSpec((None, 1, 128), lambda n: (n, 0, 0)),  # v5e/v6e)
        scratch_shapes=scratch_shapes,
        compiler_params=pltpu.CompilerParams(dimension_semantics=("parallel",)),
        cost_estimate=pl.CostEstimate(flops=int(flops), transcendentals=0,
                                      bytes_accessed=int(bytes_accessed)),
    )(*args)
    return y[:, 0, :1]                   # (N, 1)


# ----------------------------------------------------------------------------
# Pure-JAX f32 reference (eval mode) for a sanity check
# ----------------------------------------------------------------------------
def _conv1d_ref(x, w, b, stride, padding, dilation):
    N, Cin, L = x.shape
    Cout, _, K = w.shape
    xp = jnp.pad(x, ((0, 0), (0, 0), (padding, padding)))
    Lp = L + 2 * padding
    Lout = (Lp - (dilation * (K - 1) + 1)) // stride + 1
    out = jnp.zeros((N, Cout, Lout), jnp.float32)
    for t in range(K):
        start = t * dilation
        xt = xp[:, :, start: start + stride * (Lout - 1) + 1: stride]
        out = out + jnp.einsum("oc,ncl->nol", w[:, :, t], xt)
    return out + b[None, :, None]


def reference_forward(x, params):
    h = x
    for i, p in enumerate(params["blocks"]):
        d = 2 ** i
        K = p["v1"].shape[-1]
        w1 = weight_norm_weight(p["v1"], p["g1"])
        w2 = weight_norm_weight(p["v2"], p["g2"])
        y = _conv1d_ref(h, w1, p["b1"], stride=2, padding=0, dilation=d)
        y = jnp.maximum(y, 0.0)
        y = jnp.pad(y, ((0, 0), (0, 0), (0, 2 ** i)))        # F.pad(out, (0, 2**i))
        y = _conv1d_ref(y, w2, p["b2"], stride=1,
                        padding=(d * (K - 1)) // 2, dilation=d)
        y = jnp.maximum(y, 0.0)
        res = _conv1d_ref(h, p["wds"], p["bds"], stride=2, padding=0, dilation=1)
        s = y + res
        gamma = p["bn_w"] / jnp.sqrt(p["bn_var"] + 1e-5)
        beta = p["bn_b"] - p["bn_mean"] * gamma
        h = jnp.maximum(s * gamma[None, :, None] + beta[None, :, None], 0.0)
    flat = h.reshape(h.shape[0], -1)
    return flat @ params["reg_w"].T + params["reg_b"][None, :]


# ----------------------------------------------------------------------------
# Deterministic parameter construction (shapes follow the module's __init__)
# ----------------------------------------------------------------------------
def init_params(key, num_inputs, first_out, num_blocks, kernel_size=3):
    blocks = []
    for i in range(num_blocks):
        cin = num_inputs if i == 0 else first_out * 2 ** (i - 1)
        cout = first_out if i == 0 else cin * 2
        key, *ks = jax.random.split(key, 13)
        blocks.append(dict(
            v1=0.01 * jax.random.normal(ks[0], (cout, cin, kernel_size), jnp.float32),
            g1=1.0 + 0.1 * jax.random.normal(ks[1], (cout,), jnp.float32),
            b1=0.01 * jax.random.normal(ks[2], (cout,), jnp.float32),
            v2=0.01 * jax.random.normal(ks[3], (cout, cout, kernel_size), jnp.float32),
            g2=1.0 + 0.1 * jax.random.normal(ks[4], (cout,), jnp.float32),
            b2=0.01 * jax.random.normal(ks[5], (cout,), jnp.float32),
            wds=0.01 * jax.random.normal(ks[6], (cout, cin, 1), jnp.float32),
            bds=0.01 * jax.random.normal(ks[7], (cout,), jnp.float32),
            bn_w=1.0 + 0.05 * jax.random.normal(ks[8], (cout,), jnp.float32),
            bn_b=0.05 * jax.random.normal(ks[9], (cout,), jnp.float32),
            bn_mean=0.05 * jax.random.normal(ks[10], (cout,), jnp.float32),
            bn_var=1.0 + 0.1 * jnp.abs(jax.random.normal(ks[11], (cout,), jnp.float32)),
        ))
    key, kw, kb = jax.random.split(key, 3)
    return dict(
        blocks=blocks,
        reg_w=0.01 * jax.random.normal(kw, (1, 8192), jnp.float32),
        reg_b=0.01 * jax.random.normal(kb, (1,), jnp.float32),
    )


# ----------------------------------------------------------------------------
if __name__ == "__main__":
    # TemporalConvNet(num_inputs=4, first_output_num_channels=64, num_blocks=2)
    # Input (N=2, C=4, L=256): lengths 256 -> 128 -> 64, channels 4 -> 64 -> 128,
    # so the flattened feature count is 128*64 = 8192, matching nn.Linear(8192, 1).
    num_inputs, first_out, num_blocks = 4, 64, 2
    N, L = 2, 256

    key = jax.random.PRNGKey(0)
    key, kx = jax.random.split(key)
    x = jax.random.normal(kx, (N, num_inputs, L), dtype=jnp.float32)
    params = init_params(key, num_inputs, first_out, num_blocks)

    prepped = prepare_params(params, L)          # one-time, outside the jitted fwd
    fwd = jax.jit(temporal_conv_net_forward)
    out = jax.block_until_ready(fwd(x, prepped))
    assert out.shape == (N, 1) and out.dtype == jnp.float32

    # loose sanity check against the pure-f32 reference (kernel uses bf16 MXU
    # inputs with f32 accumulation, so only coarse agreement is expected)
    ref = reference_forward(x, params)
    np.testing.assert_allclose(np.asarray(out), np.asarray(ref), rtol=0.1, atol=0.1)

    print("KERNEL_OK")
</pallas_src>

<mosaic_0001>
module attributes {stable_mosaic.version = 11 : i64} {
  func.func @kernel(%arg0: i32, %arg1: memref<1x4x128xf32, #tpu.memory_space<vmem>>, %arg2: memref<1x4x128xf32, #tpu.memory_space<vmem>>, %arg3: memref<64x12xbf16, #tpu.memory_space<vmem>>, %arg4: memref<64x4xbf16, #tpu.memory_space<vmem>>, %arg5: memref<3x64x64xbf16, #tpu.memory_space<vmem>>, %arg6: memref<5x64x1xf32, #tpu.memory_space<vmem>>, %arg7: memref<3x128x64xbf16, #tpu.memory_space<vmem>>, %arg8: memref<128x64xbf16, #tpu.memory_space<vmem>>, %arg9: memref<3x128x128xbf16, #tpu.memory_space<vmem>>, %arg10: memref<5x128x1xf32, #tpu.memory_space<vmem>>, %arg11: memref<128x64xbf16, #tpu.memory_space<vmem>>, %arg12: memref<128x64xf32, #tpu.memory_space<vmem>>, %arg13: memref<1x1xf32, #tpu.memory_space<vmem>>, %arg14: memref<1x1x128xf32, #tpu.memory_space<vmem>>, %arg15: memref<64x256xbf16, #tpu.memory_space<vmem>>, %arg16: memref<128x128xbf16, #tpu.memory_space<vmem>>) attributes {dimension_semantics = [#tpu.dimension_semantics<parallel>], iteration_bounds = array<i64: 2>, scalar_prefetch = 0 : i64, scratch_operands = 2 : i64, tpu.core_type = #tpu.core_type<tc>, window_params = [{transform_indices = @transform_0, window_bounds = array<i64: 1, 4, 128>}, {transform_indices = @transform_1, window_bounds = array<i64: 1, 4, 128>}, {pipeline_mode = #tpu.pipeline_mode<synchronous>, transform_indices = @transform_2, window_bounds = array<i64: 64, 12>}, {pipeline_mode = #tpu.pipeline_mode<synchronous>, transform_indices = @transform_3, window_bounds = array<i64: 64, 4>}, {pipeline_mode = #tpu.pipeline_mode<synchronous>, transform_indices = @transform_4, window_bounds = array<i64: 3, 64, 64>}, {pipeline_mode = #tpu.pipeline_mode<synchronous>, transform_indices = @transform_5, window_bounds = array<i64: 5, 64, 1>}, {pipeline_mode = #tpu.pipeline_mode<synchronous>, transform_indices = @transform_6, window_bounds = array<i64: 3, 128, 64>}, {pipeline_mode = #tpu.pipeline_mode<synchronous>, transform_indices = @transform_7, window_bounds = array<i64: 128, 64>}, {pipeline_mode = #tpu.pipeline_mode<synchronous>, transform_indices = @transform_8, window_bounds = array<i64: 3, 128, 128>}, {pipeline_mode = #tpu.pipeline_mode<synchronous>, transform_indices = @transform_9, window_bounds = array<i64: 5, 128, 1>}, {pipeline_mode = #tpu.pipeline_mode<synchronous>, transform_indices = @transform_10, window_bounds = array<i64: 128, 64>}, {pipeline_mode = #tpu.pipeline_mode<synchronous>, transform_indices = @transform_11, window_bounds = array<i64: 128, 64>}, {pipeline_mode = #tpu.pipeline_mode<synchronous>, transform_indices = @transform_12, window_bounds = array<i64: 1, 1>}, {transform_indices = @transform_13, window_bounds = array<i64: 1, 1, 128>}]} {
    %c0 = arith.constant 0 : index
    %c0_0 = arith.constant 0 : index
    %c0_1 = arith.constant 0 : index
    %0 = vector.load %arg1[%c0, %c0_0, %c0_1] : memref<1x4x128xf32, #tpu.memory_space<vmem>>, vector<1x4x128xf32>
    %1 = vector.shape_cast %0 : vector<1x4x128xf32> to vector<4x128xf32>
    %c0_2 = arith.constant 0 : index
    %c0_3 = arith.constant 0 : index
    %c0_4 = arith.constant 0 : index
    %2 = vector.load %arg2[%c0_2, %c0_3, %c0_4] : memref<1x4x128xf32, #tpu.memory_space<vmem>>, vector<1x4x128xf32>
    %3 = vector.shape_cast %2 : vector<1x4x128xf32> to vector<4x128xf32>
    %4 = vector.extract_strided_slice %1 {offsets = [0, 0], sizes = [4, 127], strides = [1, 1]} : vector<4x128xf32> to vector<4x127xf32>
    %5 = vector.extract_strided_slice %3 {offsets = [0, 0], sizes = [4, 127], strides = [1, 1]} : vector<4x128xf32> to vector<4x127xf32>
    %6 = vector.extract_strided_slice %1 {offsets = [0, 1], sizes = [4, 127], strides = [1, 1]} : vector<4x128xf32> to vector<4x127xf32>
    %7 = tpu.concatenate %4, %5, %6 in 0 : vector<4x127xf32>, vector<4x127xf32>, vector<4x127xf32> -> vector<12x127xf32>
    %8 = arith.truncf %7 : vector<12x127xf32> to vector<12x127xbf16>
    %c0_5 = arith.constant 0 : index
    %c0_6 = arith.constant 0 : index
    %9 = vector.load %arg3[%c0_5, %c0_6] : memref<64x12xbf16, #tpu.memory_space<vmem>>, vector<64x12xbf16>
    %cst = arith.constant dense<0.000000e+00> : vector<64x127xf32>
    %10 = tpu.matmul %9, %8, %cst {dimension_numbers = #tpu.dot_dimension_numbers<[1], [0], [0], [1], [0, 0, 1, 1], [], []>} : vector<64x12xbf16>, vector<12x127xbf16>, vector<64x127xf32> -> vector<64x127xf32>
    %11 = arith.truncf %1 : vector<4x128xf32> to vector<4x128xbf16>
    %c0_7 = arith.constant 0 : index
    %c0_8 = arith.constant 0 : index
    %c0_9 = arith.constant 0 : index
    %12 = vector.load %arg6[%c0_7, %c0_8, %c0_9] : memref<5x64x1xf32, #tpu.memory_space<vmem>>, vector<1x64x1xf32>
    %13 = vector.shape_cast %12 : vector<1x64x1xf32> to vector<64x1xf32>
    %14 = vector.broadcast %13 : vector<64x1xf32> to vector<64x127xf32>
    %15 = arith.addf %10, %14 : vector<64x127xf32>
    %cst_10 = arith.constant 0.000000e+00 : f32
    %16 = vector.broadcast %cst_10 : f32 to vector<64x127xf32>
    %17 = arith.maximumf %15, %16 : vector<64x127xf32>
    %c0_11 = arith.constant 0 : index
    %c0_12 = arith.constant 0 : index
    %18 = vector.load %arg4[%c0_11, %c0_12] : memref<64x4xbf16, #tpu.memory_space<vmem>>, vector<64x4xbf16>
    %cst_13 = arith.constant dense<0.000000e+00> : vector<64x128xf32>
    %19 = tpu.matmul %18, %11, %cst_13 {dimension_numbers = #tpu.dot_dimension_numbers<[1], [0], [0], [1], [0, 0, 1, 1], [], []>} : vector<64x4xbf16>, vector<4x128xbf16>, vector<64x128xf32> -> vector<64x128xf32>
    %c1 = arith.constant 1 : index
    %c0_14 = arith.constant 0 : index
    %c0_15 = arith.constant 0 : index
    %20 = vector.load %arg6[%c1, %c0_14, %c0_15] : memref<5x64x1xf32, #tpu.memory_space<vmem>>, vector<1x64x1xf32>
    %21 = vector.shape_cast %20 : vector<1x64x1xf32> to vector<64x1xf32>
    %22 = vector.broadcast %21 : vector<64x1xf32> to vector<64x128xf32>
    %23 = arith.addf %19, %22 : vector<64x128xf32>
    %cst_16 = arith.constant 0.000000e+00 : bf16
    %24 = vector.broadcast %cst_16 : bf16 to vector<64x256xbf16>
    %c0_17 = arith.constant 0 : index
    %c0_18 = arith.constant 0 : index
    %25 = vector.load %arg15[%c0_17, %c0_18] : memref<64x256xbf16, #tpu.memory_space<vmem>>, vector<64x256xbf16>
    tpu.vector_store %arg15[%c0_17, %c0_18], %24 {strides = array<i32>} : memref<64x256xbf16, #tpu.memory_space<vmem>>, vector<64x256xbf16>,
    %26 = arith.truncf %17 : vector<64x127xf32> to vector<64x127xbf16>
    %c0_19 = arith.constant 0 : index
    %c1_20 = arith.constant 1 : index
    %27 = vector.load %arg15[%c0_19, %c1_20] : memref<64x256xbf16, #tpu.memory_space<vmem>>, vector<64x127xbf16>
    tpu.vector_store %arg15[%c0_19, %c1_20], %26 {strides = array<i32>} : memref<64x256xbf16, #tpu.memory_space<vmem>>, vector<64x127xbf16>,
    %c0_21 = arith.constant 0 : index
    %c0_22 = arith.constant 0 : index
    %28 = vector.load %arg15[%c0_21, %c0_22] : memref<64x256xbf16, #tpu.memory_space<vmem>>, vector<64x128xbf16>
    %c0_23 = arith.constant 0 : index
    %c0_24 = arith.constant 0 : index
    %c0_25 = arith.constant 0 : index
    %29 = vector.load %arg5[%c0_23, %c0_24, %c0_25] : memref<3x64x64xbf16, #tpu.memory_space<vmem>>, vector<1x64x64xbf16>
    %30 = vector.shape_cast %29 : vector<1x64x64xbf16> to vector<64x64xbf16>
    %cst_26 = arith.constant dense<0.000000e+00> : vector<64x128xf32>
    %31 = tpu.matmul %30, %28, %cst_26 {dimension_numbers = #tpu.dot_dimension_numbers<[1], [0], [0], [1], [0, 0, 1, 1], [], []>} : vector<64x64xbf16>, vector<64x128xbf16>, vector<64x128xf32> -> vector<64x128xf32>
    %c0_27 = arith.constant 0 : index
    %c1_28 = arith.constant 1 : index
    %32 = vector.load %arg15[%c0_27, %c1_28] : memref<64x256xbf16, #tpu.memory_space<vmem>>, vector<64x128xbf16>
    %c1_29 = arith.constant 1 : index
    %c0_30 = arith.constant 0 : index
    %c0_31 = arith.constant 0 : index
    %33 = vector.load %arg5[%c1_29, %c0_30, %c0_31] : memref<3x64x64xbf16, #tpu.memory_space<vmem>>, vector<1x64x64xbf16>
    %34 = vector.shape_cast %33 : vector<1x64x64xbf16> to vector<64x64xbf16>
    %cst_32 = arith.constant dense<0.000000e+00> : vector<64x128xf32>
    %35 = tpu.matmul %34, %32, %cst_32 {dimension_numbers = #tpu.dot_dimension_numbers<[1], [0], [0], [1], [0, 0, 1, 1], [], []>} : vector<64x64xbf16>, vector<64x128xbf16>, vector<64x128xf32> -> vector<64x128xf32>
    %36 = arith.addf %31, %35 : vector<64x128xf32>
    %c0_33 = arith.constant 0 : index
    %c2 = arith.constant 2 : index
    %37 = vector.load %arg15[%c0_33, %c2] : memref<64x256xbf16, #tpu.memory_space<vmem>>, vector<64x128xbf16>
    %c2_34 = arith.constant 2 : index
    %c0_35 = arith.constant 0 : index
    %c0_36 = arith.constant 0 : index
    %38 = vector.load %arg5[%c2_34, %c0_35, %c0_36] : memref<3x64x64xbf16, #tpu.memory_space<vmem>>, vector<1x64x64xbf16>
    %39 = vector.shape_cast %38 : vector<1x64x64xbf16> to vector<64x64xbf16>
    %cst_37 = arith.constant dense<0.000000e+00> : vector<64x128xf32>
    %40 = tpu.matmul %39, %37, %cst_37 {dimension_numbers = #tpu.dot_dimension_numbers<[1], [0], [0], [1], [0, 0, 1, 1], [], []>} : vector<64x64xbf16>, vector<64x128xbf16>, vector<64x128xf32> -> vector<64x128xf32>
    %41 = arith.addf %36, %40 : vector<64x128xf32>
    %c2_38 = arith.constant 2 : index
    %c0_39 = arith.constant 0 : index
    %c0_40 = arith.constant 0 : index
    %42 = vector.load %arg6[%c2_38, %c0_39, %c0_40] : memref<5x64x1xf32, #tpu.memory_space<vmem>>, vector<1x64x1xf32>
    %43 = vector.shape_cast %42 : vector<1x64x1xf32> to vector<64x1xf32>
    %44 = vector.broadcast %43 : vector<64x1xf32> to vector<64x128xf32>
    %45 = arith.addf %41, %44 : vector<64x128xf32>
    %cst_41 = arith.constant 0.000000e+00 : f32
    %46 = vector.broadcast %cst_41 : f32 to vector<64x128xf32>
    %47 = arith.maximumf %45, %46 : vector<64x128xf32>
    %48 = arith.addf %47, %23 : vector<64x128xf32>
    %c3 = arith.constant 3 : index
    %c0_42 = arith.constant 0 : index
    %c0_43 = arith.constant 0 : index
    %49 = vector.load %arg6[%c3, %c0_42, %c0_43] : memref<5x64x1xf32, #tpu.memory_space<vmem>>, vector<1x64x1xf32>
    %50 = vector.shape_cast %49 : vector<1x64x1xf32> to vector<64x1xf32>
    %51 = vector.broadcast %50 : vector<64x1xf32> to vector<64x128xf32>
    %52 = arith.mulf %48, %51 : vector<64x128xf32>
    %c4 = arith.constant 4 : index
    %c0_44 = arith.constant 0 : index
    %c0_45 = arith.constant 0 : index
    %53 = vector.load %arg6[%c4, %c0_44, %c0_45] : memref<5x64x1xf32, #tpu.memory_space<vmem>>, vector<1x64x1xf32>
    %54 = vector.shape_cast %53 : vector<1x64x1xf32> to vector<64x1xf32>
    %55 = vector.broadcast %54 : vector<64x1xf32> to vector<64x128xf32>
    %56 = arith.addf %52, %55 : vector<64x128xf32>
    %cst_46 = arith.constant 0.000000e+00 : f32
    %57 = vector.broadcast %cst_46 : f32 to vector<64x128xf32>
    %58 = arith.maximumf %56, %57 : vector<64x128xf32>
    %59 = arith.truncf %58 : vector<64x128xf32> to vector<64x128xbf16>
    %c0_47 = arith.constant 0 : index
    %c0_48 = arith.constant 0 : index
    %60 = vector.load %arg11[%c0_47, %c0_48] : memref<128x64xbf16, #tpu.memory_space<vmem>>, vector<128x64xbf16>
    %cst_49 = arith.constant dense<0.000000e+00> : vector<64x64xf32>
    %61 = tpu.matmul %59, %60, %cst_49 {dimension_numbers = #tpu.dot_dimension_numbers<[1], [0], [0], [1], [0, 0, 1, 1], [], []>} : vector<64x128xbf16>, vector<128x64xbf16>, vector<64x64xf32> -> vector<64x64xf32>
    %62 = arith.truncf %61 : vector<64x64xf32> to vector<64x64xbf16>
    %63 = vector.extract_strided_slice %62 {offsets = [0, 0], sizes = [64, 62], strides = [1, 1]} : vector<64x64xbf16> to vector<64x62xbf16>
    %c0_50 = arith.constant 0 : index
    %c0_51 = arith.constant 0 : index
    %c0_52 = arith.constant 0 : index
    %64 = vector.load %arg7[%c0_50, %c0_51, %c0_52] : memref<3x128x64xbf16, #tpu.memory_space<vmem>>, vector<1x128x64xbf16>
    %65 = vector.shape_cast %64 : vector<1x128x64xbf16> to vector<128x64xbf16>
    %cst_53 = arith.constant dense<0.000000e+00> : vector<128x62xf32>
    %66 = tpu.matmul %65, %63, %cst_53 {dimension_numbers = #tpu.dot_dimension_numbers<[1], [0], [0], [1], [0, 0, 1, 1], [], []>} : vector<128x64xbf16>, vector<64x62xbf16>, vector<128x62xf32> -> vector<128x62xf32>
    %67 = vector.extract_strided_slice %62 {offsets = [0, 1], sizes = [64, 62], strides = [1, 1]} : vector<64x64xbf16> to vector<64x62xbf16>
    %c1_54 = arith.constant 1 : index
    %c0_55 = arith.constant 0 : index
    %c0_56 = arith.constant 0 : index
    %68 = vector.load %arg7[%c1_54, %c0_55, %c0_56] : memref<3x128x64xbf16, #tpu.memory_space<vmem>>, vector<1x128x64xbf16>
    %69 = vector.shape_cast %68 : vector<1x128x64xbf16> to vector<128x64xbf16>
    %cst_57 = arith.constant dense<0.000000e+00> : vector<128x62xf32>
    %70 = tpu.matmul %69, %67, %cst_57 {dimension_numbers = #tpu.dot_dimension_numbers<[1], [0], [0], [1], [0, 0, 1, 1], [], []>} : vector<128x64xbf16>, vector<64x62xbf16>, vector<128x62xf32> -> vector<128x62xf32>
    %71 = arith.addf %66, %70 : vector<128x62xf32>
    %72 = vector.extract_strided_slice %62 {offsets = [0, 2], sizes = [64, 62], strides = [1, 1]} : vector<64x64xbf16> to vector<64x62xbf16>
    %c2_58 = arith.constant 2 : index
    %c0_59 = arith.constant 0 : index
    %c0_60 = arith.constant 0 : index
    %73 = vector.load %arg7[%c2_58, %c0_59, %c0_60] : memref<3x128x64xbf16, #tpu.memory_space<vmem>>, vector<1x128x64xbf16>
    %74 = vector.shape_cast %73 : vector<1x128x64xbf16> to vector<128x64xbf16>
    %cst_61 = arith.constant dense<0.000000e+00> : vector<128x62xf32>
    %75 = tpu.matmul %74, %72, %cst_61 {dimension_numbers = #tpu.dot_dimension_numbers<[1], [0], [0], [1], [0, 0, 1, 1], [], []>} : vector<128x64xbf16>, vector<64x62xbf16>, vector<128x62xf32> -> vector<128x62xf32>
    %76 = arith.addf %71, %75 : vector<128x62xf32>
    %c0_62 = arith.constant 0 : index
    %c0_63 = arith.constant 0 : index
    %c0_64 = arith.constant 0 : index
    %77 = vector.load %arg10[%c0_62, %c0_63, %c0_64] : memref<5x128x1xf32, #tpu.memory_space<vmem>>, vector<1x128x1xf32>
    %78 = vector.shape_cast %77 : vector<1x128x1xf32> to vector<128x1xf32>
    %79 = vector.broadcast %78 : vector<128x1xf32> to vector<128x62xf32>
    %80 = arith.addf %76, %79 : vector<128x62xf32>
    %cst_65 = arith.constant 0.000000e+00 : f32
    %81 = vector.broadcast %cst_65 : f32 to vector<128x62xf32>
    %82 = arith.maximumf %80, %81 : vector<128x62xf32>
    %c0_66 = arith.constant 0 : index
    %c0_67 = arith.constant 0 : index
    %83 = vector.load %arg8[%c0_66, %c0_67] : memref<128x64xbf16, #tpu.memory_space<vmem>>, vector<128x64xbf16>
    %cst_68 = arith.constant dense<0.000000e+00> : vector<128x64xf32>
    %84 = tpu.matmul %83, %62, %cst_68 {dimension_numbers = #tpu.dot_dimension_numbers<[1], [0], [0], [1], [0, 0, 1, 1], [], []>} : vector<128x64xbf16>, vector<64x64xbf16>, vector<128x64xf32> -> vector<128x64xf32>
    %c1_69 = arith.constant 1 : index
    %c0_70 = arith.constant 0 : index
    %c0_71 = arith.constant 0 : index
    %85 = vector.load %arg10[%c1_69, %c0_70, %c0_71] : memref<5x128x1xf32, #tpu.memory_space<vmem>>, vector<1x128x1xf32>
    %86 = vector.shape_cast %85 : vector<1x128x1xf32> to vector<128x1xf32>
    %87 = vector.broadcast %86 : vector<128x1xf32> to vector<128x64xf32>
    %88 = arith.addf %84, %87 : vector<128x64xf32>
    %cst_72 = arith.constant 0.000000e+00 : bf16
    %89 = vector.broadcast %cst_72 : bf16 to vector<128x128xbf16>
    %c0_73 = arith.constant 0 : index
    %c0_74 = arith.constant 0 : index
    %90 = vector.load %arg16[%c0_73, %c0_74] : memref<128x128xbf16, #tpu.memory_space<vmem>>, vector<128x128xbf16>
    tpu.vector_store %arg16[%c0_73, %c0_74], %89 {strides = array<i32>} : memref<128x128xbf16, #tpu.memory_space<vmem>>, vector<128x128xbf16>,
    %91 = arith.truncf %82 : vector<128x62xf32> to vector<128x62xbf16>
    %c0_75 = arith.constant 0 : index
    %c2_76 = arith.constant 2 : index
    %92 = vector.load %arg16[%c0_75, %c2_76] : memref<128x128xbf16, #tpu.memory_space<vmem>>, vector<128x62xbf16>
    tpu.vector_store %arg16[%c0_75, %c2_76], %91 {strides = array<i32>} : memref<128x128xbf16, #tpu.memory_space<vmem>>, vector<128x62xbf16>,
    %c0_77 = arith.constant 0 : index
    %c0_78 = arith.constant 0 : index
    %93 = vector.load %arg16[%c0_77, %c0_78] : memref<128x128xbf16, #tpu.memory_space<vmem>>, vector<128x64xbf16>
    %c0_79 = arith.constant 0 : index
    %c0_80 = arith.constant 0 : index
    %c0_81 = arith.constant 0 : index
    %94 = vector.load %arg9[%c0_79, %c0_80, %c0_81] : memref<3x128x128xbf16, #tpu.memory_space<vmem>>, vector<1x128x128xbf16>
    %95 = vector.shape_cast %94 : vector<1x128x128xbf16> to vector<128x128xbf16>
    %cst_82 = arith.constant dense<0.000000e+00> : vector<128x64xf32>
    %96 = tpu.matmul %95, %93, %cst_82 {dimension_numbers = #tpu.dot_dimension_numbers<[1], [0], [0], [1], [0, 0, 1, 1], [], []>} : vector<128x128xbf16>, vector<128x64xbf16>, vector<128x64xf32> -> vector<128x64xf32>
    %c0_83 = arith.constant 0 : index
    %c2_84 = arith.constant 2 : index
    %97 = vector.load %arg16[%c0_83, %c2_84] : memref<128x128xbf16, #tpu.memory_space<vmem>>, vector<128x64xbf16>
    %c1_85 = arith.constant 1 : index
    %c0_86 = arith.constant 0 : index
    %c0_87 = arith.constant 0 : index
    %98 = vector.load %arg9[%c1_85, %c0_86, %c0_87] : memref<3x128x128xbf16, #tpu.memory_space<vmem>>, vector<1x128x128xbf16>
    %99 = vector.shape_cast %98 : vector<1x128x128xbf16> to vector<128x128xbf16>
    %cst_88 = arith.constant dense<0.000000e+00> : vector<128x64xf32>
    %100 = tpu.matmul %99, %97, %cst_88 {dimension_numbers = #tpu.dot_dimension_numbers<[1], [0], [0], [1], [0, 0, 1, 1], [], []>} : vector<128x128xbf16>, vector<128x64xbf16>, vector<128x64xf32> -> vector<128x64xf32>
    %101 = arith.addf %96, %100 : vector<128x64xf32>
    %c0_89 = arith.constant 0 : index
    %c4_90 = arith.constant 4 : index
    %102 = vector.load %arg16[%c0_89, %c4_90] : memref<128x128xbf16, #tpu.memory_space<vmem>>, vector<128x64xbf16>
    %c2_91 = arith.constant 2 : index
    %c0_92 = arith.constant 0 : index
    %c0_93 = arith.constant 0 : index
    %103 = vector.load %arg9[%c2_91, %c0_92, %c0_93] : memref<3x128x128xbf16, #tpu.memory_space<vmem>>, vector<1x128x128xbf16>
    %104 = vector.shape_cast %103 : vector<1x128x128xbf16> to vector<128x128xbf16>
    %cst_94 = arith.constant dense<0.000000e+00> : vector<128x64xf32>
    %105 = tpu.matmul %104, %102, %cst_94 {dimension_numbers = #tpu.dot_dimension_numbers<[1], [0], [0], [1], [0, 0, 1, 1], [], []>} : vector<128x128xbf16>, vector<128x64xbf16>, vector<128x64xf32> -> vector<128x64xf32>
    %106 = arith.addf %101, %105 : vector<128x64xf32>
    %c2_95 = arith.constant 2 : index
    %c0_96 = arith.constant 0 : index
    %c0_97 = arith.constant 0 : index
    %107 = vector.load %arg10[%c2_95, %c0_96, %c0_97] : memref<5x128x1xf32, #tpu.memory_space<vmem>>, vector<1x128x1xf32>
    %108 = vector.shape_cast %107 : vector<1x128x1xf32> to vector<128x1xf32>
    %109 = vector.broadcast %108 : vector<128x1xf32> to vector<128x64xf32>
    %110 = arith.addf %106, %109 : vector<128x64xf32>
    %cst_98 = arith.constant 0.000000e+00 : f32
    %111 = vector.broadcast %cst_98 : f32 to vector<128x64xf32>
    %112 = arith.maximumf %110, %111 : vector<128x64xf32>
    %113 = arith.addf %112, %88 : vector<128x64xf32>
    %c3_99 = arith.constant 3 : index
    %c0_100 = arith.constant 0 : index
    %c0_101 = arith.constant 0 : index
    %114 = vector.load %arg10[%c3_99, %c0_100, %c0_101] : memref<5x128x1xf32, #tpu.memory_space<vmem>>, vector<1x128x1xf32>
    %115 = vector.shape_cast %114 : vector<1x128x1xf32> to vector<128x1xf32>
    %116 = vector.broadcast %115 : vector<128x1xf32> to vector<128x64xf32>
    %117 = arith.mulf %113, %116 : vector<128x64xf32>
    %c4_102 = arith.constant 4 : index
    %c0_103 = arith.constant 0 : index
    %c0_104 = arith.constant 0 : index
    %118 = vector.load %arg10[%c4_102, %c0_103, %c0_104] : memref<5x128x1xf32, #tpu.memory_space<vmem>>, vector<1x128x1xf32>
    %119 = vector.shape_cast %118 : vector<1x128x1xf32> to vector<128x1xf32>
    %120 = vector.broadcast %119 : vector<128x1xf32> to vector<128x64xf32>
    %121 = arith.addf %117, %120 : vector<128x64xf32>
    %cst_105 = arith.constant 0.000000e+00 : f32
    %122 = vector.broadcast %cst_105 : f32 to vector<128x64xf32>
    %123 = arith.maximumf %121, %122 : vector<128x64xf32>
    %c0_106 = arith.constant 0 : index
    %c0_107 = arith.constant 0 : index
    %124 = vector.load %arg12[%c0_106, %c0_107] : memref<128x64xf32, #tpu.memory_space<vmem>>, vector<128x64xf32>
    %125 = arith.mulf %123, %124 : vector<128x64xf32>
    %cst_108 = arith.constant dense<0.000000e+00> : vector<128xf32>
    %126 = vector.multi_reduction <add>, %125, %cst_108 [1] : vector<128x64xf32> to vector<128xf32>
    %127 = vector.shape_cast %126 : vector<128xf32> to vector<128x1xf32>
    %cst_109 = arith.constant dense<0.000000e+00> : vector<1xf32>
    %128 = vector.multi_reduction <add>, %127, %cst_109 [0] : vector<128x1xf32> to vector<1xf32>
    %129 = vector.shape_cast %128 : vector<1xf32> to vector<1x1xf32>
    %c0_110 = arith.constant 0 : index
    %c0_111 = arith.constant 0 : index
    %130 = vector.load %arg13[%c0_110, %c0_111] : memref<1x1xf32, #tpu.memory_space<vmem>>, vector<1x1xf32>
    %131 = arith.addf %129, %130 : vector<1x1xf32>
    %132 = vector.shape_cast %131 : vector<1x1xf32> to vector<1x1xf32>
    %133 = vector.broadcast %132 : vector<1x1xf32> to vector<1x128xf32>
    %c0_112 = arith.constant 0 : index
    %c0_113 = arith.constant 0 : index
    %c0_114 = arith.constant 0 : index
    %134 = vector.load %arg14[%c0_112, %c0_113, %c0_114] : memref<1x1x128xf32, #tpu.memory_space<vmem>>, vector<1x1x128xf32>
    %135 = vector.shape_cast %134 : vector<1x1x128xf32> to vector<1x128xf32>
    %136 = vector.shape_cast %133 : vector<1x128xf32> to vector<1x1x128xf32>
    tpu.vector_store %arg14[%c0_112, %c0_113, %c0_114], %136 {strides = array<i32>} : memref<1x1x128xf32, #tpu.memory_space<vmem>>, vector<1x1x128xf32>,
    return
  }
  func.func @transform_0(%arg0: i32) -> (i32, i32, i32) {
    %c0_i32 = arith.constant 0 : i32
    %c0_i32_0 = arith.constant 0 : i32
    %c0_i32_1 = arith.constant 0 : i32
    return %arg0, %c0_i32, %c0_i32_0 : i32, i32, i32
  }
  func.func @transform_1(%arg0: i32) -> (i32, i32, i32) {
    %c0_i32 = arith.constant 0 : i32
    %c0_i32_0 = arith.constant 0 : i32
    %c0_i32_1 = arith.constant 0 : i32
    return %arg0, %c0_i32, %c0_i32_0 : i32, i32, i32
  }
  func.func @transform_2(%arg0: i32) -> (i32, i32) {
    %c0_i32 = arith.constant 0 : i32
    %c0_i32_0 = arith.constant 0 : i32
    %c0_i32_1 = arith.constant 0 : i32
    return %c0_i32, %c0_i32_0 : i32, i32
  }
  func.func @transform_3(%arg0: i32) -> (i32, i32) {
    %c0_i32 = arith.constant 0 : i32
    %c0_i32_0 = arith.constant 0 : i32
    %c0_i32_1 = arith.constant 0 : i32
    return %c0_i32, %c0_i32_0 : i32, i32
  }
  func.func @transform_4(%arg0: i32) -> (i32, i32, i32) {
    %c0_i32 = arith.constant 0 : i32
    %c0_i32_0 = arith.constant 0 : i32
    %c0_i32_1 = arith.constant 0 : i32
    %c0_i32_2 = arith.constant 0 : i32
    return %c0_i32, %c0_i32_0, %c0_i32_1 : i32, i32, i32
  }
  func.func @transform_5(%arg0: i32) -> (i32, i32, i32) {
    %c0_i32 = arith.constant 0 : i32
    %c0_i32_0 = arith.constant 0 : i32
    %c0_i32_1 = arith.constant 0 : i32
    %c0_i32_2 = arith.constant 0 : i32
    return %c0_i32, %c0_i32_0, %c0_i32_1 : i32, i32, i32
  }
  func.func @transform_6(%arg0: i32) -> (i32, i32, i32) {
    %c0_i32 = arith.constant 0 : i32
    %c0_i32_0 = arith.constant 0 : i32
    %c0_i32_1 = arith.constant 0 : i32
    %c0_i32_2 = arith.constant 0 : i32
    return %c0_i32, %c0_i32_0, %c0_i32_1 : i32, i32, i32
  }
  func.func @transform_7(%arg0: i32) -> (i32, i32) {
    %c0_i32 = arith.constant 0 : i32
    %c0_i32_0 = arith.constant 0 : i32
    %c0_i32_1 = arith.constant 0 : i32
    return %c0_i32, %c0_i32_0 : i32, i32
  }
  func.func @transform_8(%arg0: i32) -> (i32, i32, i32) {
    %c0_i32 = arith.constant 0 : i32
    %c0_i32_0 = arith.constant 0 : i32
    %c0_i32_1 = arith.constant 0 : i32
    %c0_i32_2 = arith.constant 0 : i32
    return %c0_i32, %c0_i32_0, %c0_i32_1 : i32, i32, i32
  }
  func.func @transform_9(%arg0: i32) -> (i32, i32, i32) {
    %c0_i32 = arith.constant 0 : i32
    %c0_i32_0 = arith.constant 0 : i32
    %c0_i32_1 = arith.constant 0 : i32
    %c0_i32_2 = arith.constant 0 : i32
    return %c0_i32, %c0_i32_0, %c0_i32_1 : i32, i32, i32
  }
  func.func @transform_10(%arg0: i32) -> (i32, i32) {
    %c0_i32 = arith.constant 0 : i32
    %c0_i32_0 = arith.constant 0 : i32
    %c0_i32_1 = arith.constant 0 : i32
    return %c0_i32, %c0_i32_0 : i32, i32
  }
  func.func @transform_11(%arg0: i32) -> (i32, i32) {
    %c0_i32 = arith.constant 0 : i32
    %c0_i32_0 = arith.constant 0 : i32
    %c0_i32_1 = arith.constant 0 : i32
    return %c0_i32, %c0_i32_0 : i32, i32
  }
  func.func @transform_12(%arg0: i32) -> (i32, i32) {
    %c0_i32 = arith.constant 0 : i32
    %c0_i32_0 = arith.constant 0 : i32
    %c0_i32_1 = arith.constant 0 : i32
    return %c0_i32, %c0_i32_0 : i32, i32
  }
  func.func @transform_13(%arg0: i32) -> (i32, i32, i32) {
    %c0_i32 = arith.constant 0 : i32
    %c0_i32_0 = arith.constant 0 : i32
    %c0_i32_1 = arith.constant 0 : i32
    return %arg0, %c0_i32, %c0_i32_0 : i32, i32, i32
  }
}

</mosaic_0001>

<bundles_post_ra>
// kernel: temporal_conv_net_forward.1
= control target key start
LH: loop header
LB: loop body
LE: loop exit
PB: predicated region body
PF: predicated region fallthrough
CT: control target
= control target key end

     0   :  { %s4745_s27 = smov 0   ;;  %s5970_s0 = inlined_call_operand.vmem [shape: f32[2,4,128], index: 0, kind: input, shape index: {}]   ;;  %s5971_s1 = inlined_call_operand.vmem [shape: f32[2,4,128], index: 1, kind: input, shape index: {}]   ;;  %s5972_s2 = inlined_call_operand.vmem [shape: bf16[64,12], index: 2, kind: input, shape index: {}]   ;;  %s5973_s3 = inlined_call_operand.vmem [shape: bf16[64,4], index: 3, kind: input, shape index: {}]   ;;  %s5974_s4 = inlined_call_operand.vmem [shape: bf16[3,64,64], index: 4, kind: input, shape index: {}]   ;;  %s5975_s5 = inlined_call_operand.vmem [shape: f32[5,64,1], index: 5, kind: input, shape index: {}]   ;;  %s5976_s6 = inlined_call_operand.vmem [shape: bf16[3,128,64], index: 6, kind: input, shape index: {}]   ;;  %s5977_s7 = inlined_call_operand.vmem [shape: bf16[128,64], index: 7, kind: input, shape index: {}]   ;;  %s5978_s8 = inlined_call_operand.vmem [shape: bf16[3,128,128], index: 8, kind: input, shape index: {}]   ;;  %s5979_s9 = inlined_call_operand.vmem [shape: f32[5,128,1], index: 9, kind: input, shape index: {}]   ;;  %s5980_s10 = inlined_call_operand.vmem [shape: bf16[128,64], index: 10, kind: input, shape index: {}]   ;;  %s5981_s11 = inlined_call_operand.vmem [shape: f32[128,64], index: 11, kind: input, shape index: {}]   ;;  %s5982_s12 = inlined_call_operand.<no memory space> [shape: f32[1,1], index: 12, kind: input, shape index: {}]   ;;  %s5983_s13 = inlined_call_operand.vmem [shape: f32[2,1,128], index: 13, kind: output, shape index: {}]  }
   0x1   :  { %v18_v0 = vstv %s5982_s12 }
   0x2   :  { %19 = vst [vmem:[#allocation4] sm:$0x1] %v18_v0 }
   0x3 LB: > { %s3713_s28 = sadd.s32 4294967295, %s4664_s27   ;;  %p3717_p0 = scmp.ge.s32.totalorder %s4664_s27, 1  ;;  %s4664_s27 = sphi %s4745_s27, %s25_s27  }
   0x4   : > { %p397_p1 = scmp.lt.s32.totalorder %s4664_s27, 3 }
   0x6   : > { %p398_p2 = pnand %p3717_p0, %p397_p1 }
   0x8   : > { %401 = sbr.rel (%p398_p2) target bundleno = 2396 (0x95c), region = 72 }
   0xf   : > { %p442_p3 = scmp.lt.s32.totalorder %s3713_s28, 1  ;;  %v4574_v1 = vld [vmem:[%s5972_s2] sm:$0xff]   ;;  %vm543_vm0 = vcmask 97280   ;;  %vm463_vm1 = vcmask 1043456   ;;  %s4666_s20 = smov 127   ;;  %v476_v5 = vld [vmem:[%s5975_s5 + $0x8] sm:$0xff] }
  0x10   : > { %4178 = vmatprep.mubr.msk.bf16.mxu0 %vm543_vm0, %v4574_v1  ;;  %vm723_vm2 = vcmask 1041408   ;;  %v4667_v8 = vmov 0   ;;  %v475_v9 = vld [vmem:[%s5975_s5] sm:$0xff]  ;;  %vm710_vm3 = vcmask 31744   ;;  %v477_v10 = vld [vmem:[%s5975_s5 + $0x10] sm:$0xff]  ;;  %v4579_v14 = vld [vmem:[%s5973_s3 + $0x8] sm:$0xff]  }
  0x11   : > { %s6005_s28 = smov (!%p442_p3, %s3713_s28), 1  ;;  %4573 = vset.pattern.permute.xlu1 %v4667_v8  ;;  %792 = vst [vmem:[#allocation2] sm:$0xff] %v4667_v8  ;;  %794 = vst [vmem:[#allocation2 + $0x10] sm:$0xff] %v4667_v8  ;;  %4572 = vset.pattern.permute.xlu0 %v4667_v8  ;;  %v479_v11 = vld [vmem:[%s5975_s5 + $0x20] sm:$0xff]  ;;  %v478_v15 = vld [vmem:[%s5975_s5 + $0x18] sm:$0xff]  ;;  %vm556_vm4 = vcmask 1045504  }
  0x12   : > { %s3718_s12 = sshll.u32 %s6005_s28, 2  ;;  %796 = vst [vmem:[#allocation2 + $0x20] sm:$0xff] %v4667_v8  ;;  %798 = vst [vmem:[#allocation2 + $0x30] sm:$0xff] %v4667_v8  ;;  %490 = vperm.xlu1 %4573, %v476_v5   ;;  %v4578_v13 = vld [vmem:[%s5973_s3] sm:$0xff]   ;;  %v481_v16 = vld [vmem:[%s5975_s5 + $0x30] sm:$0xff]  ;;  %s4668_s21 = smov 1  }
  0x13   : > { %s445_s16 = scalar_lea.vmem %s5970_s0, %s3718_s12  ;;  %s449_s19 = scalar_lea.vmem %s5971_s1, %s3718_s12  ;;  %2532 = vst [vmem:[#allocation3] sm:$0xff] %v4667_v8  ;;  %2533 = vst [vmem:[#allocation3 + $0x8] sm:$0xff] %v4667_v8  ;;  %4188 = vmatprep.mubr.msk.bf16.mxu1 %vm710_vm3, %v4578_v13  ;;  %v480_v17 = vld [vmem:[%s5975_s5 + $0x28] sm:$0xff]  ;;  %v482_v18 = vld [vmem:[%s5975_s5 + $0x38] sm:$0xff]  ;;  %vm820_vm5 = vcmask 1047560   ;;  %vm907_vm6 = vcmask 523264  }
  0x14   : > { %v454_v2 = vld [vmem:[%s445_s16] sm:$0xf]  ;;  %2534 = vst [vmem:[#allocation3 + $0x10] sm:$0xff] %v4667_v8  ;;  %2535 = vst [vmem:[#allocation3 + $0x18] sm:$0xff] %v4667_v8  ;;  %v4575_v22 = vld [vmem:[%s5972_s2 + $0x8] sm:$0xff]   ;;  %s4669_s22 = smov 126  }
  0x15   : > { %v455_v3 = vld [vmem:[%s449_s19] sm:$0xf]  ;;  %460 = vrot.lane.b32.xlu0 %v454_v2, %s4666_s20  ;;  %v474_v6 = vpack.c.bf16 %v454_v2, %v454_v2  ;;  %2536 = vst [vmem:[#allocation3 + $0x20] sm:$0xff] %v4667_v8  ;;  %2537 = vst [vmem:[#allocation3 + $0x28] sm:$0xff] %v4667_v8  ;;  %v4576_v23 = vld [vmem:[%s5972_s2 + $0x10] sm:$0xff]   ;;  %vm898_vm7 = vcmask 1039360  }
  0x16   : > { %v457_v4 = vrot.slane %v455_v3, 4  ;;  %2538 = vst [vmem:[#allocation3 + $0x30] sm:$0xff] %v4667_v8  ;;  %2539 = vst [vmem:[#allocation3 + $0x38] sm:$0xff] %v4667_v8  ;;  %495 = vperm.xlu1 %4573, %v477_v10   ;;  %v4577_v24 = vld [vmem:[%s5972_s2 + $0x18] sm:$0xff]   ;;  %v4580_v25 = vld [vmem:[%s5973_s3 + $0x10] sm:$0xff]   ;;  %vm1127_vm8 = vcmask 1031168  }
  0x17   : > { %4557 = vmatprep.subr.msk.bf16.mxu1 %vm723_vm2, %v474_v6  ;;  %v725_v12 = vsel %vm723_vm2, %v474_v6, 0  ;;  %v4581_v26 = vld [vmem:[%s5973_s3 + $0x18] sm:$0xff]   ;;  %v3785_v63 = vld [vmem:[%s5975_s5 + $0x88] sm:$0xff]  ;;  %s4670_s18 = smov 2   ;;  %vm2580_vm9 = vcmask 523280   ;;  %s4671_s23 = smov 124  }
  0x18   : > { %v464_v7 = vsel %vm463_vm1, %v454_v2, %v457_v4  ;;  %4187 = vmatpush3.bf16.msra.mxu1 %v725_v12  ;;  %v3787_v0 = vld [vmem:[%s5975_s5 + $0x98] sm:$0xff]  ;;  %v3729_v3 = vld [vmem:[%s5975_s5 + $0x48] sm:$0xff] }
  0x19   : > { %485 = vperm.xlu0 %4572, %v475_v9   ;;  %v3731_v6 = vld [vmem:[%s5975_s5 + $0x58] sm:$0xff]  ;;  %v3789_v9 = vld [vmem:[%s5975_s5 + $0xa8] sm:$0xff] }
  0x1a   : > { %500 = vperm.xlu1 %4573, %v478_v15   ;;  %v3801_v10 = vld [vmem:[%s5975_s5 + $0x108] sm:$0xff]  ;;  %v3803_v12 = vld [vmem:[%s5975_s5 + $0x118] sm:$0xff] }
  0x1b   : > { %4189 = vmatmul.mubr.msk.bf16.vlgmr.msra.gmra.mrb[0].mxu1 %vm710_vm3, %v4579_v14  ;;  %v3733_v14 = vld [vmem:[%s5975_s5 + $0x68] sm:$0xff] }
  0x1c   : > { %4192 = vmatprep.mubr.msk.bf16.mxu1 %vm710_vm3, %v4580_v25 }
  0x1d   : > { %505 = vperm.xlu0 %4572, %v479_v11   ;;  %v3791_v11 = vld [vmem:[%s5975_s5 + $0xb8] sm:$0xff] }
  0x1e   : > { %510 = vperm.xlu1 %4573, %v480_v17  }
  0x21   : > { %515 = vperm.xlu0 %4572, %v481_v16  }
  0x22   : > { %520 = vperm.xlu1 %4573, %v482_v18   ;;  %v3735_v18 = vld [vmem:[%s5975_s5 + $0x78] sm:$0xff] }
  0x23   : > { %4193 = vmatmul.mubr.msk.bf16.gmra.mrb[4].mxu1 %vm710_vm3, %v4581_v26 }
  0x87   : > { %v461_v19 = vpop.permute.xlu0 %460 }
  0x88   : > { %v465_v20 = vpack.c.bf16 %v461_v19, %v464_v7  ;;  %v3793_v7 = vld [vmem:[%s5975_s5 + $0xc8] sm:$0xff] }
  0x89   : > { %v3797_v19 = vld [vmem:[%s5975_s5 + $0xe8] sm:$0xff] }
  0x8a   : > { %4556 = vmatprep.subr.msk.bf16.mxu0 %vm556_vm4, %v465_v20  ;;  %v558_v21 = vsel %vm556_vm4, %v465_v20, 0  ;;  %v3799_v20 = vld [vmem:[%s5975_s5 + $0xf8] sm:$0xff] }
  0x8b   : > { %4177 = vmatpush3.bf16.msra.mxu0 %v558_v21  ;;  %v3805_v21 = vld [vmem:[%s5975_s5 + $0x128] sm:$0xff] }
  0x8e   : > { %4179 = vmatmul.mubr.msk.bf16.vlgmr.msra.gmra.mrb[0].mxu0 %vm543_vm0, %v4575_v22  ;;  %v3807_v22 = vld [vmem:[%s5975_s5 + $0x138] sm:$0xff] }
  0x8f   : > { %4182 = vmatprep.mubr.msk.bf16.mxu0 %vm543_vm0, %v4576_v23 }
  0x91   : > { %v491_v27 = vpop.permute.xlu1 %490 }
  0x95   : > { %v496_v28 = vpop.permute.xlu1 %495 }
  0x96   : > { %4183 = vmatmul.mubr.msk.bf16.gmra.mrb[4].mxu0 %vm543_vm0, %v4577_v24 }
  0x98   : > { %v486_v29 = vpop.permute.xlu0 %485 }
  0x99   : > { %v501_v30 = vpop.permute.xlu1 %500 }
  0x9c   : > { %v506_v34 = vpop.permute.xlu0 %505 }
  0x9d   : > { %v511_v39 = vpop.permute.xlu1 %510 }
  0xa0   : > { %v516_v46 = vpop.permute.xlu0 %515 }
  0xa1   : > { %v521_v51 = vpop.permute.xlu1 %520 }
  0xee   : > { %v4857_v1 = vpop.f32.mrb[0].mxu1 }
  0xef   : > { %v4859_v2 = vpop.f32.mrb[1].mxu1 }
  0xf0   : > { %v4864_v4 = vpop.f32.mrb[2].mxu1 }
  0xf1   : > { %v4866_v5 = vpop.f32.mrb[3].mxu1 }
  0xf6   : > { %v4889_v13 = vpop.f32.mrb[4].mxu1 }
  0xf7   : > { %v4894_v15 = vpop.f32.mrb[5].mxu1 }
  0xf8   : > { %v4896_v16 = vpop.f32.mrb[6].mxu1 }
  0xf9   : > { %v4898_v17 = vpop.f32.mrb[7].mxu1 }
 0x161   : > { %v4180_v31 = vpop.f32.mrb[0].mxu0 }
 0x162   : > { %v603_v32 = vadd.f32 %v4180_v31, %v496_v28  ;;  %v594_v33 = vpop.f32.mrb[1].mxu0  ;;  %v4582_v28 = vld [vmem:[%s5974_s4 + $0x20] sm:$0xff]  }
 0x163   : > { %v595_v35 = vadd.f32 %v594_v33, %v486_v29  ;;  %v4181_v36 = vpop.f32.mrb[2].mxu0  ;;  %4204 = vmatprep.mubr.msk.bf16.mxu0 %vm907_vm6, %v4582_v28  ;;  %v3786_v33 = vld [vmem:[%s5975_s5 + $0x90] sm:$0xff]  ;;  %v4591_v28 = vld [vmem:[%s5974_s4 + $0x48] sm:$0xff]  }
 0x164   : > { %v606_v37 = vadd.f32 %v4181_v36, %v501_v30  ;;  %v597_v38 = vpop.f32.mrb[3].mxu0  ;;  %v627_v41 = vmax.f32 %v603_v32, 0.0  ;;  %v3784_v32 = vld [vmem:[%s5975_s5 + $0x80] sm:$0xff] }
 0x165   : > { %v598_v40 = vadd.f32 %v597_v38, %v491_v27  ;;  %v625_v43 = vmax.f32 %v595_v35, 0.0  ;;  %v3730_v35 = vld [vmem:[%s5975_s5 + $0x50] sm:$0xff]  ;;  %v3792_v36 = vld [vmem:[%s5975_s5 + $0xc0] sm:$0xff] }
 0x166   : > { %v628_v42 = vmax.f32 %v606_v37, 0.0  ;;  %v3794_v37 = vld [vmem:[%s5975_s5 + $0xd0] sm:$0xff]  ;;  %v3788_v38 = vld [vmem:[%s5975_s5 + $0xa0] sm:$0xff] }
 0x167   : > { %v626_v44 = vmax.f32 %v598_v40, 0.0  ;;  %v3790_v40 = vld [vmem:[%s5975_s5 + $0xb0] sm:$0xff] }
 0x168   : > { %v801_v45 = vpack.c.bf16 %v628_v42, %v627_v41  ;;  %v3802_v41 = vld [vmem:[%s5975_s5 + $0x110] sm:$0xff]  ;;  %v3732_v42 = vld [vmem:[%s5975_s5 + $0x60] sm:$0xff] }
 0x169   : > { %v800_v47 = vpack.c.bf16 %v626_v44, %v625_v43  ;;  %v4184_v48 = vpop.f32.mrb[4].mxu0  ;;  %v3734_v43 = vld [vmem:[%s5975_s5 + $0x70] sm:$0xff]  ;;  %v3796_v44 = vld [vmem:[%s5975_s5 + $0xe0] sm:$0xff] }
 0x16a   : > { %v619_v49 = vadd.f32 %v4184_v48, %v516_v46  ;;  %810 = vrot.lane.b32.xlu1 %v801_v45, %s4668_s21  ;;  %v610_v50 = vpop.f32.mrb[5].mxu0  ;;  %v3798_v45 = vld [vmem:[%s5975_s5 + $0xf0] sm:$0xff]  ;;  %v3804_v46 = vld [vmem:[%s5975_s5 + $0x120] sm:$0xff] }
 0x16b   : > { %v611_v52 = vadd.f32 %v610_v50, %v506_v34  ;;  %v4185_v53 = vpop.f32.mrb[6].mxu0  ;;  %808 = vrot.lane.b32.xlu0 %v800_v47, %s4668_s21  ;;  %v3728_v34 = vld [vmem:[%s5975_s5 + $0x40] sm:$0xff]  ;;  %v3806_v47 = vld [vmem:[%s5975_s5 + $0x130] sm:$0xff] }
 0x16c   : > { %v622_v54 = vadd.f32 %v4185_v53, %v521_v51  ;;  %v613_v55 = vpop.f32.mrb[7].mxu0  ;;  %v631_v57 = vmax.f32 %v619_v49, 0.0  ;;  %v4594_v48 = vld [vmem:[%s5980_s10] sm:$0xff]   ;;  %v4595_v49 = vld [vmem:[%s5980_s10 + $0x8] sm:$0xff]   ;;  %v4596_v50 = vld [vmem:[%s5980_s10 + $0x10] sm:$0xff]  }
 0x16d   : > { %v614_v56 = vadd.f32 %v613_v55, %v511_v39  ;;  %v629_v59 = vmax.f32 %v611_v52, 0.0  ;;  %v3800_v39 = vld [vmem:[%s5975_s5 + $0x100] sm:$0xff]  ;;  %4244 = vmatprep.subr.bf16.mxu1 %v4594_v48  ;;  %v4597_v51 = vld [vmem:[%s5980_s10 + $0x18] sm:$0xff]  }
 0x16e   : > { %v632_v58 = vmax.f32 %v622_v54, 0.0  ;;  %4245 = vmatpush3.bf16.msra.mxu1 %v4594_v48 }
 0x16f   : > { %v630_v60 = vmax.f32 %v614_v56, 0.0  ;;  %4246 = vmatprep.subr.bf16.mxu1 %v4595_v49 }
 0x170   : > { %v803_v61 = vpack.c.bf16 %v632_v58, %v631_v57 }
 0x171   : > { %v802_v62 = vpack.c.bf16 %v630_v60, %v629_v59 }
 0x172   : > { %814 = vrot.lane.b32.xlu1 %v803_v61, %s4668_s21  ;;  %4247 = vmatpush3.bf16.msra.mxu1 %v4595_v49 }
 0x173   : > { %812 = vrot.lane.b32.xlu0 %v802_v62, %s4668_s21  ;;  %4248 = vmatprep.subr.bf16.mxu1 %v4596_v50 }
 0x176   : > { %884 = vrot.lane.b32.xlu1 %v4667_v8, %s4666_s20  ;;  %4249 = vmatpush3.bf16.msra.mxu1 %v4596_v50 }
 0x177   : > { %4250 = vmatprep.subr.bf16.mxu1 %v4597_v51 }
 0x17a   : > { %888 = vrot.lane.b32.xlu1 %v4667_v8, %s4666_s20  ;;  %4251 = vmatpush3.bf16.msra.mxu1 %v4597_v51 }
 0x17e   : > { %892 = vrot.lane.b32.xlu1 %v4667_v8, %s4666_s20 }
 0x182   : > { %896 = vrot.lane.b32.xlu1 %v4667_v8, %s4666_s20 }
 0x186   : > { %1113 = vrot.lane.b32.xlu1 %v4667_v8, %s4669_s22 }
 0x18a   : > { %1117 = vrot.lane.b32.xlu1 %v4667_v8, %s4669_s22 }
 0x18e   : > { %1121 = vrot.lane.b32.xlu1 %v4667_v8, %s4669_s22 }
 0x192   : > { %1125 = vrot.lane.b32.xlu1 %v4667_v8, %s4669_s22  ;;  %v3795_v8 = vld [vmem:[%s5975_s5 + $0xd8] sm:$0xff] }
 0x196   : > { %1237 = vperm.xlu1 %4573, %v3785_v63  }
 0x19a   : > { %1247 = vperm.xlu1 %4573, %v3787_v0   ;;  %v4583_v0 = vld [vmem:[%s5974_s4 + $0x28] sm:$0xff]  }
 0x19e   : > { %657 = vperm.xlu1 %4573, %v3729_v3   ;;  %v4584_v3 = vld [vmem:[%s5974_s4 + $0x30] sm:$0xff]  }
 0x1a2   : > { %667 = vperm.xlu1 %4573, %v3731_v6  }
 0x1a6   : > { %1310 = vperm.xlu1 %4573, %v3793_v7   ;;  %v4585_v7 = vld [vmem:[%s5974_s4 + $0x38] sm:$0xff]  }
 0x1aa   : > { %1320 = vperm.xlu1 %4573, %v3795_v8   ;;  %v4586_v8 = vld [vmem:[%s5974_s4] sm:$0xff]  }
 0x1ae   : > { %1257 = vperm.xlu1 %4573, %v3789_v9  }
 0x1b2   : > { %1367 = vperm.xlu1 %4573, %v3801_v10  }
 0x1b6   : > { %1267 = vperm.xlu1 %4573, %v3791_v11  }
 0x1ba   : > { %1377 = vperm.xlu1 %4573, %v3803_v12   ;;  %v4587_v12 = vld [vmem:[%s5974_s4 + $0x8] sm:$0xff]  }
 0x1be   : > { %677 = vperm.xlu1 %4573, %v3733_v14  }
 0x1c2   : > { %687 = vperm.xlu1 %4573, %v3735_v18   ;;  %v4588_v18 = vld [vmem:[%s5974_s4 + $0x10] sm:$0xff]  }
 0x1c6   : > { %1330 = vperm.xlu1 %4573, %v3797_v19  }
 0x1ca   : > { %1340 = vperm.xlu1 %4573, %v3799_v20  }
 0x1ce   : > { %1387 = vperm.xlu1 %4573, %v3805_v21  }
 0x1d2   : > { %1397 = vperm.xlu1 %4573, %v3807_v22   ;;  %v4589_v22 = vld [vmem:[%s5974_s4 + $0x18] sm:$0xff]  }
 0x1dc   : > { %v811_v23 = vpop.permute.xlu1 %810 }
 0x1dd   : > { %822 = vst.msk [vmem:[#allocation2 + $0x10] sm:$0xff] %vm820_vm5, %v811_v23  ;;  %v809_v24 = vpop.permute.xlu0 %808 }
 0x1de   : > { %821 = vst.msk [vmem:[#allocation2] sm:$0xff] %vm820_vm5, %v809_v24  ;;  %v4590_v24 = vld [vmem:[%s5974_s4 + $0x40] sm:$0xff]  }
 0x1e4   : > { %v815_v25 = vpop.permute.xlu1 %814  ;;  %v4922_v29 = vld [vmem:[#allocation2 + $0x10] sm:$0xff] }
 0x1e5   : > { %824 = vst.msk [vmem:[#allocation2 + $0x30] sm:$0xff] %vm820_vm5, %v815_v25  ;;  %v813_v26 = vpop.permute.xlu0 %812  ;;  %v4915_v27 = vld [vmem:[#allocation2] sm:$0xff] }
 0x1e6   : > { %823 = vst.msk [vmem:[#allocation2 + $0x20] sm:$0xff] %vm820_vm5, %v813_v26  ;;  %882 = vrot.lane.b32.xlu0 %v4915_v27, %s4666_s20 }
 0x1e8   : > { %v885_v52 = vpop.permute.xlu1 %884 }
 0x1ea   : > { %886 = vrot.lane.b32.xlu0 %v4922_v29, %s4666_s20 }
 0x1ec   : > { %v4931_v31 = vld [vmem:[#allocation2 + $0x30] sm:$0xff]  ;;  %v889_v53 = vpop.permute.xlu1 %888 }
 0x1ed   : > { %v4927_v30 = vld [vmem:[#allocation2 + $0x20] sm:$0xff] }
 0x1ee   : > { %890 = vrot.lane.b32.xlu0 %v4927_v30, %s4666_s20 }
 0x1f0   : > { %v893_v58 = vpop.permute.xlu1 %892 }
 0x1f2   : > { %894 = vrot.lane.b32.xlu0 %v4931_v31, %s4666_s20 }
 0x1f4   : > { %v897_v61 = vpop.permute.xlu1 %896 }
 0x1f6   : > { %1111 = vrot.lane.b32.xlu0 %v4915_v27, %s4669_s22 }
 0x1f8   : > { %v1114_v9 = vpop.permute.xlu1 %1113 }
 0x1fa   : > { %1115 = vrot.lane.b32.xlu0 %v4922_v29, %s4669_s22 }
 0x1fc   : > { %v1118_v11 = vpop.permute.xlu1 %1117 }
 0x1fe   : > { %1119 = vrot.lane.b32.xlu0 %v4927_v30, %s4669_s22 }
 0x200   : > { %v1122_v21 = vpop.permute.xlu1 %1121 }
 0x202   : > { %1123 = vrot.lane.b32.xlu0 %v4931_v31, %s4669_s22 }
 0x204   : > { %v1126_v26 = vpop.permute.xlu1 %1125 }
 0x206   : > { %1232 = vperm.xlu0 %4572, %v3784_v32   ;;  %v4599_v32 = vld [vmem:[%s5980_s10 + $0x28] sm:$0xff]  }
 0x20a   : > { %1242 = vperm.xlu0 %4572, %v3786_v33   ;;  %v4600_v33 = vld [vmem:[%s5980_s10 + $0x30] sm:$0xff]  }
 0x20e   : > { %652 = vperm.xlu0 %4572, %v3728_v34   ;;  %v4601_v34 = vld [vmem:[%s5980_s10 + $0x38] sm:$0xff]  }
 0x212   : > { %662 = vperm.xlu0 %4572, %v3730_v35  }
 0x216   : > { %1305 = vperm.xlu0 %4572, %v3792_v36   ;;  %v1238_v36 = vpop.permute.xlu1 %1237 }
 0x21a   : > { %1315 = vperm.xlu0 %4572, %v3794_v37  }
 0x21e   : > { %1252 = vperm.xlu0 %4572, %v3788_v38   ;;  %v1248_v38 = vpop.permute.xlu1 %1247 }
 0x222   : > { %1362 = vperm.xlu0 %4572, %v3800_v39  }
 0x226   : > { %1262 = vperm.xlu0 %4572, %v3790_v40   ;;  %v658_v40 = vpop.permute.xlu1 %657 }
 0x22a   : > { %1372 = vperm.xlu0 %4572, %v3802_v41  }
 0x22e   : > { %672 = vperm.xlu0 %4572, %v3732_v42   ;;  %v668_v42 = vpop.permute.xlu1 %667 }
 0x232   : > { %682 = vperm.xlu0 %4572, %v3734_v43  }
 0x236   : > { %1325 = vperm.xlu0 %4572, %v3796_v44   ;;  %v1311_v44 = vpop.permute.xlu1 %1310 }
 0x23a   : > { %1335 = vperm.xlu0 %4572, %v3798_v45  }
 0x23e   : > { %1382 = vperm.xlu0 %4572, %v3804_v46   ;;  %v1321_v46 = vpop.permute.xlu1 %1320 }
 0x242   : > { %1392 = vperm.xlu0 %4572, %v3806_v47   ;;  %v1258_v48 = vpop.permute.xlu1 %1257 }
 0x246   : > { %v1368_v50 = vpop.permute.xlu1 %1367 }
 0x258   : > { %v883_v54 = vpop.permute.xlu0 %882 }
 0x259   : > { %v899_v55 = vsel %vm898_vm7, %v883_v54, %v885_v52  ;;  %v1268_v52 = vpop.permute.xlu1 %1267 }
 0x25a   : > { %4196 = vmatprep.subr.bf16.mxu0 %v899_v55 }
 0x25b   : > { %4197 = vmatpush3.bf16.msra.mxu0 %v899_v55 }
 0x25c   : > { %v887_v56 = vpop.permute.xlu0 %886 }
 0x25d   : > { %v900_v57 = vsel %vm898_vm7, %v887_v56, %v889_v53  ;;  %v1378_v54 = vpop.permute.xlu1 %1377 }
 0x25e   : > { %4198 = vmatprep.subr.bf16.mxu0 %v900_v57 }
 0x25f   : > { %4199 = vmatpush3.bf16.msra.mxu0 %v900_v57 }
 0x260   : > { %v891_v59 = vpop.permute.xlu0 %890 }
 0x261   : > { %v901_v60 = vsel %vm898_vm7, %v891_v59, %v893_v58  ;;  %v678_v56 = vpop.permute.xlu1 %677 }
 0x262   : > { %4200 = vmatprep.subr.bf16.mxu0 %v901_v60 }
 0x263   : > { %4201 = vmatpush3.bf16.msra.mxu0 %v901_v60 }
 0x264   : > { %v895_v62 = vpop.permute.xlu0 %894 }
 0x265   : > { %v902_v63 = vsel %vm898_vm7, %v895_v62, %v897_v61  ;;  %v688_v58 = vpop.permute.xlu1 %687 }
 0x266   : > { %4202 = vmatprep.subr.bf16.mxu0 %v902_v63 }
 0x267   : > { %4203 = vmatpush3.bf16.msra.mxu0 %v902_v63 }
 0x268   : > { %4212 = vmatprep.subr.bf16.mxu0 %v4915_v27  ;;  %v1112_v6 = vpop.permute.xlu0 %1111 }
 0x269   : > { %v1128_v14 = vsel %vm1127_vm8, %v1112_v6, %v1114_v9  ;;  %v5075_v60 = vpop.permute.xlu1 %1330 }
 0x26a   : > { %4205 = vmatmul.mubr.msk.bf16.vlgmr.msra.gmra.mrb[8].mxu0 %vm907_vm6, %v4583_v0 }
 0x26b   : > { %4213 = vmatpush3.bf16.msra.mxu0 %v4915_v27  ;;  %4208 = vmatprep.mubr.msk.bf16.mxu0 %vm907_vm6, %v4584_v3 }
 0x26c   : > { %4214 = vmatprep.subr.bf16.mxu0 %v4922_v29  ;;  %v1116_v10 = vpop.permute.xlu0 %1115 }
 0x26d   : > { %v1129_v20 = vsel %vm1127_vm8, %v1116_v10, %v1118_v11 }
 0x26f   : > { %4215 = vmatpush3.bf16.msra.mxu0 %v4922_v29  ;;  %v4592_v29 = vld [vmem:[%s5974_s4 + $0x50] sm:$0xff]  }
 0x270   : > { %4216 = vmatprep.subr.bf16.mxu0 %v4927_v30  ;;  %v1120_v19 = vpop.permute.xlu0 %1119 }
 0x271   : > { %v1130_v23 = vsel %vm1127_vm8, %v1120_v19, %v1122_v21  ;;  %v765_v21 = vadd.f32 %v4866_v5, %v658_v40 }
 0x272   : > { %4209 = vmatmul.mubr.msk.bf16.gmra.mrb[12].mxu0 %vm907_vm6, %v4585_v7 }
 0x273   : > { %4217 = vmatpush3.bf16.msra.mxu0 %v4927_v30  ;;  %4220 = vmatprep.mubr.msk.bf16.mxu0 %vm907_vm6, %v4586_v8  ;;  %v4593_v30 = vld [vmem:[%s5974_s4 + $0x58] sm:$0xff]  }
 0x274   : > { %4218 = vmatprep.subr.bf16.mxu0 %v4931_v31  ;;  %v1124_v25 = vpop.permute.xlu0 %1123 }
 0x275   : > { %v1131_v27 = vsel %vm1127_vm8, %v1124_v25, %v1126_v26 }
 0x277   : > { %4219 = vmatpush3.bf16.msra.mxu0 %v4931_v31  ;;  %v4598_v31 = vld [vmem:[%s5980_s10 + $0x20] sm:$0xff]  }
 0x278   : > { %4228 = vmatprep.subr.bf16.mxu0 %v1128_v14  ;;  %4252 = vmatprep.subr.bf16.mxu1 %v4598_v31 }
 0x279   : > { %4253 = vmatpush3.bf16.msra.mxu1 %v4598_v31 }
 0x27a   : > { %4221 = vmatmul.mubr.msk.bf16.vlgmr.msra.gmra.mrb[8].mxu0 %vm907_vm6, %v4587_v12  ;;  %4254 = vmatprep.subr.bf16.mxu1 %v4599_v32 }
 0x27b   : > { %4229 = vmatpush3.bf16.msra.mxu0 %v1128_v14  ;;  %4224 = vmatprep.mubr.msk.bf16.mxu0 %vm907_vm6, %v4588_v18  ;;  %v773_v18 = vadd.f32 %v4864_v4, %v668_v42  ;;  %v789_v4 = vadd.f32 %v4896_v16, %v688_v58 }
 0x27c   : > { %4230 = vmatprep.subr.bf16.mxu0 %v1129_v20 }
 0x27d   : > { %4255 = vmatpush3.bf16.msra.mxu1 %v4599_v32 }
 0x27e   : > { %4256 = vmatprep.subr.bf16.mxu1 %v4600_v33 }
 0x27f   : > { %4231 = vmatpush3.bf16.msra.mxu0 %v1129_v20 }
 0x280   : > { %4232 = vmatprep.subr.bf16.mxu0 %v1130_v23 }
 0x281   : > { %4257 = vmatpush3.bf16.msra.mxu1 %v4600_v33 }
 0x282   : > { %4225 = vmatmul.mubr.msk.bf16.gmra.mrb[12].mxu0 %vm907_vm6, %v4589_v22  ;;  %4258 = vmatprep.subr.bf16.mxu1 %v4601_v34  ;;  %v1341_v22 = vpop.permute.xlu1 %1340 }
 0x283   : > { %4233 = vmatpush3.bf16.msra.mxu0 %v1130_v23  ;;  %4236 = vmatprep.mubr.msk.bf16.mxu0 %vm907_vm6, %v4590_v24 }
 0x284   : > { %4234 = vmatprep.subr.bf16.mxu0 %v1131_v27 }
 0x285   : > { %4259 = vmatpush3.bf16.msra.mxu1 %v4601_v34  ;;  %v1233_v35 = vpop.permute.xlu0 %1232 }
 0x286   : > { %v1388_v42 = vpop.permute.xlu1 %1387 }
 0x287   : > { %4235 = vmatpush3.bf16.msra.mxu0 %v1131_v27 }
 0x289   : > { %v1243_v37 = vpop.permute.xlu0 %1242 }
 0x28a   : > { %4237 = vmatmul.mubr.msk.bf16.vlgmr.msra.gmra.mrb[8].mxu0 %vm907_vm6, %v4591_v28 }
 0x28b   : > { %4240 = vmatprep.mubr.msk.bf16.mxu0 %vm907_vm6, %v4592_v29  ;;  %v781_v29 = vadd.f32 %v4898_v17, %v678_v56 }
 0x28d   : > { %v653_v39 = vpop.permute.xlu0 %652 }
 0x28e   : > { %v762_v10 = vadd.f32 %v4859_v2, %v653_v39 }
 0x291   : > { %v663_v41 = vpop.permute.xlu0 %662 }
 0x292   : > { %4241 = vmatmul.mubr.msk.bf16.gmra.mrb[12].mxu0 %vm907_vm6, %v4593_v30  ;;  %v770_v6 = vadd.f32 %v4857_v1, %v663_v41 }
 0x295   : > { %v1306_v43 = vpop.permute.xlu0 %1305 }
 0x299   : > { %v1316_v45 = vpop.permute.xlu0 %1315 }
 0x29d   : > { %v1253_v47 = vpop.permute.xlu0 %1252 }
 0x2a1   : > { %v1363_v49 = vpop.permute.xlu0 %1362 }
 0x2a5   : > { %v1263_v51 = vpop.permute.xlu0 %1262 }
 0x2a9   : > { %v1373_v53 = vpop.permute.xlu0 %1372 }
 0x2ad   : > { %v673_v55 = vpop.permute.xlu0 %672 }
 0x2ae   : > { %v778_v17 = vadd.f32 %v4894_v15, %v673_v55  ;;  %v1398_v55 = vpop.permute.xlu1 %1397 }
 0x2b1   : > { %v683_v57 = vpop.permute.xlu0 %682 }
 0x2b5   : > { %v1326_v59 = vpop.permute.xlu0 %1325 }
 0x2b9   : > { %v1336_v11 = vpop.permute.xlu0 %1335 }
 0x2bd   : > { %v1383_v33 = vpop.permute.xlu0 %1382 }
 0x35d   : > { %v4238_v61 = vpop.f32.mrb[8].mxu0 }
 0x35e   : > { %v1272_v62 = vadd.f32 %v4238_v61, %v1243_v37  ;;  %v1182_v63 = vpop.f32.mrb[9].mxu0  ;;  %v786_v37 = vadd.f32 %v4889_v13, %v683_v57  ;;  %v1393_v57 = vpop.permute.xlu0 %1392 }
 0x35f   : > { %v1270_v0 = vadd.f32 %v1233_v35, %v1182_v63  ;;  %v4239_v3 = vpop.f32.mrb[10].mxu0 }
 0x360   : > { %v1280_v7 = vmax.f32 %v1272_v62, 0.0  ;;  %v1273_v8 = vadd.f32 %v4239_v3, %v1248_v38  ;;  %v1185_v9 = vpop.f32.mrb[11].mxu0 }
 0x361   : > { %v1278_v12 = vmax.f32 %v1270_v0, 0.0  ;;  %v1271_v14 = vadd.f32 %v1238_v36, %v1185_v9 }
 0x362   : > { %v1288_v19 = vadd.f32 %v1280_v7, %v770_v6  ;;  %v1281_v20 = vmax.f32 %v1273_v8, 0.0 }
 0x363   : > { %v1286_v23 = vadd.f32 %v1278_v12, %v762_v10  ;;  %v1279_v24 = vmax.f32 %v1271_v14, 0.0 }
 0x364   : > { %v1345_v25 = vmul.f32 %v1316_v45, %v1288_v19  ;;  %v1289_v26 = vadd.f32 %v1281_v20, %v773_v18 }
 0x365   : > { %v1343_v1 = vmul.f32 %v1306_v43, %v1286_v23  ;;  %v1287_v27 = vadd.f32 %v1279_v24, %v765_v21  ;;  %v4242_v28 = vpop.f32.mrb[12].mxu0  ;;  %v4602_v21 = vld [vmem:[%s5976_s6 + $0x40] sm:$0xff]  }
 0x366   : > { %v1402_v2 = vadd.f32 %v1373_v53, %v1345_v25  ;;  %v1346_v30 = vmul.f32 %v1321_v46, %v1289_v26  ;;  %v1276_v31 = vadd.f32 %v4242_v28, %v1263_v51  ;;  %v1198_v32 = vpop.f32.mrb[13].mxu0  ;;  %v2130_v28 = vld [vmem:[%s5979_s9] sm:$0xff] }
 0x367   : > { %v1344_v34 = vmul.f32 %v1311_v44, %v1287_v27  ;;  %v1274_v35 = vadd.f32 %v1253_v47, %v1198_v32  ;;  %v4243_v5 = vpop.f32.mrb[14].mxu0  ;;  %v1400_v36 = vadd.f32 %v1363_v49, %v1343_v1  ;;  %v2131_v27 = vld [vmem:[%s5979_s9 + $0x8] sm:$0xff]  ;;  %v2137_v32 = vld [vmem:[%s5979_s9 + $0x38] sm:$0xff] }
 0x368   : > { %v1403_v38 = vadd.f32 %v1378_v54, %v1346_v30  ;;  %v1284_v39 = vmax.f32 %v1276_v31, 0.0  ;;  %v1277_v40 = vadd.f32 %v4243_v5, %v1268_v52  ;;  %v1201_v41 = vpop.f32.mrb[15].mxu0  ;;  %v1410_v51 = vmax.f32 %v1402_v2, 0.0  ;;  %v2132_v2 = vld [vmem:[%s5979_s9 + $0x10] sm:$0xff]  ;;  %v2135_v30 = vld [vmem:[%s5979_s9 + $0x28] sm:$0xff]  ;;  %v2134_v31 = vld [vmem:[%s5979_s9 + $0x20] sm:$0xff] }
 0x369   : > { %v1282_v43 = vmax.f32 %v1274_v35, 0.0  ;;  %v1275_v45 = vadd.f32 %v1258_v48, %v1201_v41  ;;  %v1401_v46 = vadd.f32 %v1368_v50, %v1344_v34  ;;  %v1408_v58 = vmax.f32 %v1400_v36, 0.0  ;;  %v2138_v34 = vld [vmem:[%s5979_s9 + $0x40] sm:$0xff]  ;;  %v2141_v35 = vld [vmem:[%s5979_s9 + $0x58] sm:$0xff]  ;;  %v2140_v5 = vld [vmem:[%s5979_s9 + $0x50] sm:$0xff] }
 0x36a   : > { %v1411_v53 = vmax.f32 %v1403_v38, 0.0  ;;  %v1292_v16 = vadd.f32 %v1284_v39, %v786_v37  ;;  %v1285_v56 = vmax.f32 %v1277_v40, 0.0  ;;  %v2143_v36 = vld [vmem:[%s5979_s9 + $0x68] sm:$0xff]  ;;  %v2142_v37 = vld [vmem:[%s5979_s9 + $0x60] sm:$0xff]  ;;  %v2145_v38 = vld [vmem:[%s5979_s9 + $0x78] sm:$0xff] }
 0x36b   : > { %v1290_v44 = vadd.f32 %v1282_v43, %v778_v17  ;;  %v1283_v47 = vmax.f32 %v1275_v45, 0.0  ;;  %v1409_v49 = vmax.f32 %v1401_v46, 0.0  ;;  %v2144_v39 = vld [vmem:[%s5979_s9 + $0x70] sm:$0xff]  ;;  %v4603_v43 = vld [vmem:[%s5976_s6 + $0x48] sm:$0xff]   ;;  %v4605_v46 = vld [vmem:[%s5976_s6 + $0x58] sm:$0xff]  }
 0x36c   : > { %v1417_v61 = vpack.c.bf16 %v1411_v53, %v1410_v51  ;;  %v1349_v13 = vmul.f32 %v1336_v11, %v1292_v16  ;;  %v1293_v54 = vadd.f32 %v1285_v56, %v789_v4  ;;  %v2136_v4 = vld [vmem:[%s5979_s9 + $0x30] sm:$0xff]  ;;  %v4606_v51 = vld [vmem:[%s5976_s6 + $0x60] sm:$0xff]   ;;  %v4607_v53 = vld [vmem:[%s5976_s6 + $0x68] sm:$0xff]  }
 0x36d   : > { %v1347_v52 = vmul.f32 %v1326_v59, %v1290_v44  ;;  %v1291_v62 = vadd.f32 %v1283_v47, %v781_v29  ;;  %v1416_v63 = vpack.c.bf16 %v1409_v49, %v1408_v58  ;;  %v2133_v29 = vld [vmem:[%s5979_s9 + $0x18] sm:$0xff]  ;;  %v4604_v45 = vld [vmem:[%s5976_s6 + $0x50] sm:$0xff]   ;;  %v4610_v47 = vld [vmem:[%s5976_s6] sm:$0xff]  }
 0x36e   : > { %v1350_v0 = vmul.f32 %v1341_v22, %v1293_v54  ;;  %v1406_v15 = vadd.f32 %v1393_v57, %v1349_v13  ;;  %v4608_v56 = vld [vmem:[%s5976_s6 + $0x70] sm:$0xff]   ;;  %v4609_v44 = vld [vmem:[%s5976_s6 + $0x78] sm:$0xff]   ;;  %v4611_v58 = vld [vmem:[%s5976_s6 + $0x8] sm:$0xff]  }
 0x36f   : > { %v1348_v48 = vmul.f32 %v5075_v60, %v1291_v62  ;;  %4260 = vmatprep.mubr.bf16.mxu1 %v1416_v63  ;;  %v1404_v50 = vadd.f32 %v1383_v33, %v1347_v52  ;;  %v2139_v33 = vld [vmem:[%s5979_s9 + $0x48] sm:$0xff]  ;;  %v4612_v49 = vld [vmem:[%s5976_s6 + $0x10] sm:$0xff]   ;;  %v4613_v13 = vld [vmem:[%s5976_s6 + $0x18] sm:$0xff]  }
 0x370   : > { %4261 = vmatmul.mubr.bf16.vlgmr.msra.gmra.mrb[8].mxu1 %v1417_v61  ;;  %v1407_v3 = vadd.f32 %v1398_v55, %v1350_v0  ;;  %v1414_v7 = vmax.f32 %v1406_v15, 0.0  ;;  %v4614_v57 = vld [vmem:[%s5976_s6 + $0x20] sm:$0xff]   ;;  %v4615_v62 = vld [vmem:[%s5976_s6 + $0x28] sm:$0xff]   ;;  %v4616_v63 = vld [vmem:[%s5976_s6 + $0x30] sm:$0xff]  }
 0x371   : > { %v1405_v6 = vadd.f32 %v1388_v42, %v1348_v48  ;;  %v1412_v9 = vmax.f32 %v1404_v50, 0.0  ;;  %v4617_v0 = vld [vmem:[%s5976_s6 + $0x38] sm:$0xff]   ;;  %v4618_v15 = vld [vmem:[%s5976_s6 + $0x80] sm:$0xff]   ;;  %v4619_v55 = vld [vmem:[%s5976_s6 + $0x88] sm:$0xff]  }
 0x372   : > { %v1415_v8 = vmax.f32 %v1407_v3, 0.0  ;;  %v4620_v48 = vld [vmem:[%s5976_s6 + $0x90] sm:$0xff]   ;;  %v4621_v50 = vld [vmem:[%s5976_s6 + $0x98] sm:$0xff]   ;;  %v4622_v3 = vld [vmem:[%s5976_s6 + $0xa0] sm:$0xff]  }
 0x373   : > { %v1413_v10 = vmax.f32 %v1405_v6, 0.0  ;;  %v4623_v6 = vld [vmem:[%s5976_s6 + $0xa8] sm:$0xff]  }
 0x374   : > { %v1419_v11 = vpack.c.bf16 %v1415_v8, %v1414_v7  ;;  %v4624_v7 = vld [vmem:[%s5976_s6 + $0xb0] sm:$0xff]   ;;  %v4625_v8 = vld [vmem:[%s5976_s6 + $0xb8] sm:$0xff]  }
 0x375   : > { %v1418_v12 = vpack.c.bf16 %v1413_v10, %v1412_v9  ;;  %v4626_v9 = vld [vmem:[%s5977_s7] sm:$0xff]   ;;  %v4627_v10 = vld [vmem:[%s5977_s7 + $0x8] sm:$0xff]  }
 0x376   : > { %4348 = vmatprep.mubr.msk.bf16.mxu0 %vm907_vm6, %v4626_v9 }
 0x377   : > { %4264 = vmatprep.mubr.bf16.mxu1 %v1418_v12  ;;  %v4629_v12 = vld [vmem:[%s5977_s7 + $0x18] sm:$0xff]  }
 0x378   : > { %4265 = vmatmul.mubr.bf16.gmra.mrb[12].mxu1 %v1419_v11  ;;  %v4628_v11 = vld [vmem:[%s5977_s7 + $0x10] sm:$0xff]  }
 0x379   : > { %4276 = vmatprep.mubr.msk.bf16.mxu1 %vm907_vm6, %v4602_v21 }
 0x443   : > { %v4262_v59 = vpop.f32.mrb[8].mxu1 }
 0x444   : > { %v1518_v14 = vpop.f32.mrb[9].mxu1 }
 0x445   : > { %v4263_v18 = vpop.f32.mrb[10].mxu1 }
 0x446   : > { %v5086_v19 = vpack.c.bf16 %v4263_v18, %v4262_v59  ;;  %v1521_v20 = vpop.f32.mrb[11].mxu1  ;;  %v4630_v59 = vld [vmem:[%s5977_s7 + $0x20] sm:$0xff]   ;;  %v4632_v18 = vld [vmem:[%s5977_s7 + $0x30] sm:$0xff]  }
 0x447   : > { %v5088_v60 = vpack.c.bf16 %v1521_v20, %v1518_v14  ;;  %v4631_v14 = vld [vmem:[%s5977_s7 + $0x28] sm:$0xff]  }
 0x448   : > { %1632 = vrot.lane.b32.xlu1 %v5086_v19, %s4666_s20 }
 0x449   : > { %1630 = vrot.lane.b32.xlu0 %v5088_v60, %s4666_s20  ;;  %4340 = vmatprep.subr.bf16.mxu0 %v5088_v60 }
 0x44a   : > { %4341 = vmatpush3.bf16.msra.mxu0 %v5088_v60 }
 0x44b   : > { %v4266_v22 = vpop.f32.mrb[12].mxu1  ;;  %4342 = vmatprep.subr.bf16.mxu0 %v5086_v19 }
 0x44c   : > { %v1534_v23 = vpop.f32.mrb[13].mxu1 }
 0x44d   : > { %v4267_v24 = vpop.f32.mrb[14].mxu1 }
 0x44e   : > { %v5101_v25 = vpack.c.bf16 %v4267_v24, %v4266_v22  ;;  %v1537_v26 = vpop.f32.mrb[15].mxu1  ;;  %4343 = vmatpush3.bf16.msra.mxu0 %v5086_v19 }
 0x44f   : > { %v5104_v1 = vpack.c.bf16 %v1537_v26, %v1534_v23 }
 0x450   : > { %1636 = vrot.lane.b32.xlu1 %v5101_v25, %s4666_s20 }
 0x451   : > { %1634 = vrot.lane.b32.xlu0 %v5104_v1, %s4666_s20  ;;  %4344 = vmatprep.subr.bf16.mxu0 %v5104_v1 }
 0x452   : > { %4345 = vmatpush3.bf16.msra.mxu0 %v5104_v1 }
 0x453   : > { %4346 = vmatprep.subr.bf16.mxu0 %v5101_v25 }
 0x454   : > { %1983 = vrot.lane.b32.xlu1 %v5086_v19, %s4669_s22 }
 0x455   : > { %1981 = vrot.lane.b32.xlu0 %v5088_v60, %s4669_s22 }
 0x456   : > { %4347 = vmatpush3.bf16.msra.mxu0 %v5101_v25 }
 0x458   : > { %1987 = vrot.lane.b32.xlu1 %v5101_v25, %s4669_s22 }
 0x459   : > { %1985 = vrot.lane.b32.xlu0 %v5104_v1, %s4669_s22  ;;  %4349 = vmatmul.mubr.msk.bf16.vlgmr.msra.gmra.mrb[16].mxu0 %vm907_vm6, %v4627_v10 }
 0x45a   : > { %4352 = vmatprep.mubr.msk.bf16.mxu0 %vm907_vm6, %v4628_v11 }
 0x45c   : > { %2153 = vperm.xlu1 %4573, %v2131_v27  }
 0x45d   : > { %2148 = vperm.xlu0 %4572, %v2130_v28  }
 0x460   : > { %2163 = vperm.xlu1 %4573, %v2133_v29  }
 0x461   : > { %2158 = vperm.xlu0 %4572, %v2132_v2   ;;  %4353 = vmatmul.mubr.msk.bf16.gmra.mrb[20].mxu0 %vm907_vm6, %v4629_v12 }
 0x462   : > { %4356 = vmatprep.mubr.msk.bf16.mxu0 %vm907_vm6, %v4630_v59 }
 0x464   : > { %2173 = vperm.xlu1 %4573, %v2135_v30  }
 0x465   : > { %2168 = vperm.xlu0 %4572, %v2134_v31  }
 0x468   : > { %2183 = vperm.xlu1 %4573, %v2137_v32  }
 0x469   : > { %2178 = vperm.xlu0 %4572, %v2136_v4   ;;  %4357 = vmatmul.mubr.msk.bf16.gmra.mrb[24].mxu0 %vm907_vm6, %v4631_v14 }
 0x46a   : > { %4360 = vmatprep.mubr.msk.bf16.mxu0 %vm907_vm6, %v4632_v18 }
 0x46c   : > { %2193 = vperm.xlu1 %4573, %v2139_v33  }
 0x46d   : > { %2188 = vperm.xlu0 %4572, %v2138_v34  }
 0x470   : > { %2203 = vperm.xlu1 %4573, %v2141_v35  }
 0x471   : > { %2198 = vperm.xlu0 %4572, %v2140_v5  }
 0x474   : > { %2213 = vperm.xlu1 %4573, %v2143_v36  }
 0x475   : > { %2208 = vperm.xlu0 %4572, %v2142_v37  }
 0x478   : > { %2223 = vperm.xlu1 %4573, %v2145_v38  }
 0x479   : > { %2218 = vperm.xlu0 %4572, %v2144_v39  }
 0x4ba   : > { %v1633_v41 = vpop.permute.xlu1 %1632 }
 0x4bb   : > { %v1631_v40 = vpop.permute.xlu0 %1630 }
 0x4bc   : > { %4268 = vmatprep.subr.bf16.mxu1 %v1631_v40 }
 0x4bd   : > { %4269 = vmatpush3.bf16.msra.mxu1 %v1631_v40 }
 0x4be   : > { %4270 = vmatprep.subr.bf16.mxu1 %v1633_v41 }
 0x4c1   : > { %4271 = vmatpush3.bf16.msra.mxu1 %v1633_v41 }
 0x4c2   : > { %v1637_v17 = vpop.permute.xlu1 %1636 }
 0x4c3   : > { %v1635_v42 = vpop.permute.xlu0 %1634 }
 0x4c4   : > { %4272 = vmatprep.subr.bf16.mxu1 %v1635_v42 }
 0x4c5   : > { %4273 = vmatpush3.bf16.msra.mxu1 %v1635_v42 }
 0x4c6   : > { %4274 = vmatprep.subr.bf16.mxu1 %v1637_v17  ;;  %v1984_v61 = vpop.permute.xlu1 %1983 }
 0x4c7   : > { %v1982_v16 = vpop.permute.xlu0 %1981 }
 0x4c9   : > { %4275 = vmatpush3.bf16.msra.mxu1 %v1637_v17 }
 0x4ca   : > { %4292 = vmatprep.subr.bf16.mxu1 %v5088_v60  ;;  %v1988_v52 = vpop.permute.xlu1 %1987 }
 0x4cb   : > { %v1986_v54 = vpop.permute.xlu0 %1985 }
 0x4cc   : > { %4277 = vmatmul.mubr.msk.bf16.vlgmr.msra.gmra.mrb[16].mxu1 %vm907_vm6, %v4603_v43 }
 0x4cd   : > { %4293 = vmatpush3.bf16.msra.mxu1 %v5088_v60  ;;  %4280 = vmatprep.mubr.msk.bf16.mxu1 %vm907_vm6, %v4604_v45 }
 0x4ce   : > { %4294 = vmatprep.subr.bf16.mxu1 %v5086_v19 }
 0x4d1   : > { %4295 = vmatpush3.bf16.msra.mxu1 %v5086_v19  ;;  %v4633_v19 = vld [vmem:[%s5977_s7 + $0x38] sm:$0xff]  }
 0x4d2   : > { %4296 = vmatprep.subr.bf16.mxu1 %v5104_v1  ;;  %4361 = vmatmul.mubr.msk.bf16.gmra.mrb[28].mxu0 %vm907_vm6, %v4633_v19 }
 0x4d4   : > { %4281 = vmatmul.mubr.msk.bf16.gmra.mrb[20].mxu1 %vm907_vm6, %v4605_v46 }
 0x4d5   : > { %4297 = vmatpush3.bf16.msra.mxu1 %v5104_v1  ;;  %4284 = vmatprep.mubr.msk.bf16.mxu1 %vm907_vm6, %v4606_v51 }
 0x4d6   : > { %4298 = vmatprep.subr.bf16.mxu1 %v5101_v25 }
 0x4d9   : > { %4299 = vmatpush3.bf16.msra.mxu1 %v5101_v25 }
 0x4da   : > { %4316 = vmatprep.subr.bf16.mxu1 %v1982_v16 }
 0x4db   : > { %v2154_v60 = vpop.permute.xlu1 %2153 }
 0x4dc   : > { %4285 = vmatmul.mubr.msk.bf16.gmra.mrb[24].mxu1 %vm907_vm6, %v4607_v53  ;;  %v2149_v20 = vpop.permute.xlu0 %2148 }
 0x4dd   : > { %4288 = vmatprep.mubr.msk.bf16.mxu1 %vm907_vm6, %v4608_v56 }
 0x4df   : > { %v2164_v22 = vpop.permute.xlu1 %2163 }
 0x4e0   : > { %v2159_v21 = vpop.permute.xlu0 %2158 }
 0x4e3   : > { %v2174_v24 = vpop.permute.xlu1 %2173 }
 0x4e4   : > { %4289 = vmatmul.mubr.msk.bf16.gmra.mrb[28].mxu1 %vm907_vm6, %v4609_v44  ;;  %v2169_v23 = vpop.permute.xlu0 %2168 }
 0x4e5   : > { %4300 = vmatprep.mubr.msk.bf16.mxu1 %vm907_vm6, %v4610_v47 }
 0x4e7   : > { %v2184_v28 = vpop.permute.xlu1 %2183 }
 0x4e8   : > { %v2179_v25 = vpop.permute.xlu0 %2178 }
 0x4eb   : > { %v2194_v37 = vpop.permute.xlu1 %2193 }
 0x4ec   : > { %4301 = vmatmul.mubr.msk.bf16.vlgmr.msra.gmra.mrb[16].mxu1 %vm907_vm6, %v4611_v58  ;;  %v2189_v34 = vpop.permute.xlu0 %2188 }
 0x4ed   : > { %4317 = vmatpush3.bf16.msra.mxu1 %v1982_v16  ;;  %4304 = vmatprep.mubr.msk.bf16.mxu1 %vm907_vm6, %v4612_v49 }
 0x4ee   : > { %4318 = vmatprep.subr.bf16.mxu1 %v1984_v61 }
 0x4ef   : > { %v2204_v56 = vpop.permute.xlu1 %2203 }
 0x4f0   : > { %v2199_v46 = vpop.permute.xlu0 %2198 }
 0x4f1   : > { %4319 = vmatpush3.bf16.msra.mxu1 %v1984_v61 }
 0x4f2   : > { %4320 = vmatprep.subr.bf16.mxu1 %v1986_v54 }
 0x4f4   : > { %4305 = vmatmul.mubr.msk.bf16.gmra.mrb[20].mxu1 %vm907_vm6, %v4613_v13 }
 0x4f5   : > { %4321 = vmatpush3.bf16.msra.mxu1 %v1986_v54  ;;  %4308 = vmatprep.mubr.msk.bf16.mxu1 %vm907_vm6, %v4614_v57  ;;  %v2209_v57 = vpop.permute.xlu0 %2208 }
 0x4f6   : > { %4322 = vmatprep.subr.bf16.mxu1 %v1988_v52 }
 0x4f9   : > { %4323 = vmatpush3.bf16.msra.mxu1 %v1988_v52 }
 0x4fc   : > { %4309 = vmatmul.mubr.msk.bf16.gmra.mrb[24].mxu1 %vm907_vm6, %v4615_v62 }
 0x4fd   : > { %4312 = vmatprep.mubr.msk.bf16.mxu1 %vm907_vm6, %v4616_v63 }
 0x504   : > { %4313 = vmatmul.mubr.msk.bf16.gmra.mrb[28].mxu1 %vm907_vm6, %v4617_v0 }
 0x505   : > { %4324 = vmatprep.mubr.msk.bf16.mxu1 %vm907_vm6, %v4618_v15  ;;  %v2214_v15 = vpop.permute.xlu1 %2213 }
 0x509   : > { %v2224_v59 = vpop.permute.xlu1 %2223 }
 0x50c   : > { %4325 = vmatmul.mubr.msk.bf16.vlgmr.msra.gmra.mrb[16].mxu1 %vm907_vm6, %v4619_v55 }
 0x50d   : > { %4328 = vmatprep.mubr.msk.bf16.mxu1 %vm907_vm6, %v4620_v48 }
 0x514   : > { %4329 = vmatmul.mubr.msk.bf16.gmra.mrb[20].mxu1 %vm907_vm6, %v4621_v50 }
 0x515   : > { %4332 = vmatprep.mubr.msk.bf16.mxu1 %vm907_vm6, %v4622_v3 }
 0x51c   : > { %4333 = vmatmul.mubr.msk.bf16.gmra.mrb[24].mxu1 %vm907_vm6, %v4623_v6 }
 0x51d   : > { %4336 = vmatprep.mubr.msk.bf16.mxu1 %vm907_vm6, %v4624_v7 }
 0x524   : > { %4337 = vmatmul.mubr.msk.bf16.gmra.mrb[28].mxu1 %vm907_vm6, %v4625_v8  ;;  %v2219_v8 = vpop.permute.xlu0 %2218 }
 0x5df   : > { %v4326_v26 = vpop.f32.mrb[16].mxu1 }
 0x5e0   : > { %v2228_v1 = vadd.f32 %v4326_v26, %v2159_v21  ;;  %v2051_v27 = vpop.f32.mrb[17].mxu1 }
 0x5e1   : > { %v2226_v29 = vadd.f32 %v2149_v20, %v2051_v27  ;;  %v4327_v2 = vpop.f32.mrb[18].mxu1 }
 0x5e2   : > { %v2229_v30 = vadd.f32 %v4327_v2, %v2164_v22  ;;  %v2054_v31 = vpop.f32.mrb[19].mxu1  ;;  %v2244_v4 = vmax.f32 %v2228_v1, 0.0 }
 0x5e3   : > { %v2227_v32 = vadd.f32 %v2154_v60, %v2054_v31  ;;  %v2242_v35 = vmax.f32 %v2226_v29, 0.0 }
 0x5e4   : > { %v2245_v33 = vmax.f32 %v2229_v30, 0.0 }
 0x5e5   : > { %v2243_v5 = vmax.f32 %v2227_v32, 0.0 }
 0x5e6   : > { %v2541_v36 = vpack.c.bf16 %v2245_v33, %v2244_v4 }
 0x5e7   : > { %v2540_v38 = vpack.c.bf16 %v2243_v5, %v2242_v35  ;;  %v4330_v39 = vpop.f32.mrb[20].mxu1 }
 0x5e8   : > { %v2232_v40 = vadd.f32 %v4330_v39, %v2179_v25  ;;  %v2067_v41 = vpop.f32.mrb[21].mxu1  ;;  %2558 = vrot.lane.b32.xlu1 %v2541_v36, %s4670_s18 }
 0x5e9   : > { %v2230_v42 = vadd.f32 %v2169_v23, %v2067_v41  ;;  %v4331_v17 = vpop.f32.mrb[22].mxu1  ;;  %2556 = vrot.lane.b32.xlu0 %v2540_v38, %s4670_s18 }
 0x5ea   : > { %v2233_v43 = vadd.f32 %v4331_v17, %v2184_v28  ;;  %v2070_v45 = vpop.f32.mrb[23].mxu1  ;;  %v2248_v53 = vmax.f32 %v2232_v40, 0.0  ;;  %v5359_v40 = vpop.f32.mrb[16].mxu0  ;;  %v3896_v17 = vld [vmem:[%s5979_s9 + $0x80] sm:$0xff] }
 0x5eb   : > { %v2231_v51 = vadd.f32 %v2174_v24, %v2070_v45  ;;  %v2246_v44 = vmax.f32 %v2230_v42, 0.0  ;;  %v5362_v41 = vpop.f32.mrb[17].mxu0  ;;  %v3897_v42 = vld [vmem:[%s5979_s9 + $0x88] sm:$0xff] }
 0x5ec   : > { %v2249_v16 = vmax.f32 %v2233_v43, 0.0  ;;  %v5371_v43 = vpop.f32.mrb[18].mxu0 }
 0x5ed   : > { %v2247_v47 = vmax.f32 %v2231_v51, 0.0  ;;  %v5373_v45 = vpop.f32.mrb[19].mxu0  ;;  %v3898_v51 = vld [vmem:[%s5979_s9 + $0x90] sm:$0xff] }
 0x5ee   : > { %v2543_v58 = vpack.c.bf16 %v2249_v16, %v2248_v53  ;;  %v5381_v53 = vpop.f32.mrb[20].mxu0  ;;  %v3901_v16 = vld [vmem:[%s5979_s9 + $0xa8] sm:$0xff] }
 0x5ef   : > { %v2542_v49 = vpack.c.bf16 %v2247_v47, %v2246_v44  ;;  %v4334_v61 = vpop.f32.mrb[24].mxu1  ;;  %v3900_v44 = vld [vmem:[%s5979_s9 + $0xa0] sm:$0xff] }
 0x5f0   : > { %v2236_v13 = vadd.f32 %v4334_v61, %v2199_v46  ;;  %v2083_v54 = vpop.f32.mrb[25].mxu1  ;;  %2562 = vrot.lane.b32.xlu1 %v2543_v58, %s4670_s18  ;;  %v3899_v46 = vld [vmem:[%s5979_s9 + $0x98] sm:$0xff]  ;;  %v3902_v61 = vld [vmem:[%s5979_s9 + $0xb0] sm:$0xff] }
 0x5f1   : > { %v2234_v52 = vadd.f32 %v2189_v34, %v2083_v54  ;;  %v4335_v62 = vpop.f32.mrb[26].mxu1  ;;  %2560 = vrot.lane.b32.xlu0 %v2542_v49, %s4670_s18  ;;  %v3903_v49 = vld [vmem:[%s5979_s9 + $0xb8] sm:$0xff]  ;;  %v3905_v54 = vld [vmem:[%s5979_s9 + $0xc8] sm:$0xff] }
 0x5f2   : > { %v2237_v63 = vadd.f32 %v4335_v62, %v2204_v56  ;;  %v2086_v0 = vpop.f32.mrb[27].mxu1  ;;  %v2252_v48 = vmax.f32 %v2236_v13, 0.0  ;;  %v5386_v56 = vpop.f32.mrb[21].mxu0 }
 0x5f3   : > { %v2235_v55 = vadd.f32 %v2194_v37, %v2086_v0  ;;  %v2250_v3 = vmax.f32 %v2234_v52, 0.0  ;;  %v4634_v37 = vld [vmem:[%s5978_s8 + $0x40] sm:$0xff]   ;;  %v5391_v47 = vpop.f32.mrb[22].mxu0 }
 0x5f4   : > { %v2253_v50 = vmax.f32 %v2237_v63, 0.0  ;;  %4380 = vmatprep.mubr.bf16.mxu0 %v4634_v37  ;;  %v5393_v58 = vpop.f32.mrb[23].mxu0  ;;  %v3904_v52 = vld [vmem:[%s5979_s9 + $0xc0] sm:$0xff]  ;;  %v4644_v63 = vld [vmem:[%s5978_s8 + $0x90] sm:$0xff]  }
 0x5f5   : > { %v2251_v6 = vmax.f32 %v2235_v55, 0.0  ;;  %v5401_v13 = vpop.f32.mrb[24].mxu0  ;;  %4448 = vmatprep.mubr.bf16.mxu1 %v4644_v63  ;;  %v3906_v55 = vld [vmem:[%s5979_s9 + $0xd0] sm:$0xff]  ;;  %v4023_v63 = vld [vmem:[%s5979_s9 + $0x238] sm:$0xff] }
 0x5f6   : > { %v2545_v7 = vpack.c.bf16 %v2253_v50, %v2252_v48  ;;  %v3909_v50 = vld [vmem:[%s5979_s9 + $0xe8] sm:$0xff] }
 0x5f7   : > { %v2544_v9 = vpack.c.bf16 %v2251_v6, %v2250_v3  ;;  %v4338_v10 = vpop.f32.mrb[28].mxu1  ;;  %v3908_v6 = vld [vmem:[%s5979_s9 + $0xe0] sm:$0xff] }
 0x5f8   : > { %v2240_v11 = vadd.f32 %v4338_v10, %v2219_v8  ;;  %v2099_v12 = vpop.f32.mrb[29].mxu1  ;;  %2566 = vrot.lane.b32.xlu1 %v2545_v7, %s4670_s18  ;;  %v3910_v10 = vld [vmem:[%s5979_s9 + $0xf0] sm:$0xff] }
 0x5f9   : > { %v2238_v14 = vadd.f32 %v2209_v57, %v2099_v12  ;;  %v4339_v18 = vpop.f32.mrb[30].mxu1  ;;  %2564 = vrot.lane.b32.xlu0 %v2544_v9, %s4670_s18  ;;  %v5406_v57 = vpop.f32.mrb[25].mxu0  ;;  %v3911_v9 = vld [vmem:[%s5979_s9 + $0xf8] sm:$0xff]  ;;  %v3984_v12 = vld [vmem:[%s5979_s9 + $0x100] sm:$0xff] }
 0x5fa   : > { %v2241_v19 = vadd.f32 %v4339_v18, %v2224_v59  ;;  %v2102_v20 = vpop.f32.mrb[31].mxu1  ;;  %v2256_v21 = vmax.f32 %v2240_v11, 0.0  ;;  %v5411_v62 = vpop.f32.mrb[26].mxu0  ;;  %v3985_v11 = vld [vmem:[%s5979_s9 + $0x108] sm:$0xff]  ;;  %v3987_v59 = vld [vmem:[%s5979_s9 + $0x118] sm:$0xff]  ;;  %v4000_v18 = vld [vmem:[%s5979_s9 + $0x180] sm:$0xff] }
 0x5fb   : > { %v2239_v60 = vadd.f32 %v2214_v15, %v2102_v20  ;;  %v2254_v23 = vmax.f32 %v2238_v14, 0.0  ;;  %v5416_v0 = vpop.f32.mrb[27].mxu0  ;;  %v3907_v15 = vld [vmem:[%s5979_s9 + $0xd8] sm:$0xff]  ;;  %v3986_v14 = vld [vmem:[%s5979_s9 + $0x110] sm:$0xff]  ;;  %v3989_v20 = vld [vmem:[%s5979_s9 + $0x128] sm:$0xff] }
 0x5fc   : > { %v2257_v22 = vmax.f32 %v2241_v19, 0.0  ;;  %v5424_v48 = vpop.f32.mrb[28].mxu0  ;;  %v3988_v19 = vld [vmem:[%s5979_s9 + $0x120] sm:$0xff] }
 0x5fd   : > { %v2255_v24 = vmax.f32 %v2239_v60, 0.0  ;;  %v5429_v3 = vpop.f32.mrb[29].mxu0  ;;  %v4001_v60 = vld [vmem:[%s5979_s9 + $0x188] sm:$0xff] }
 0x5fe   : > { %v2547_v25 = vpack.c.bf16 %v2257_v22, %v2256_v21  ;;  %v5434_v7 = vpop.f32.mrb[30].mxu0  ;;  %v4016_v21 = vld [vmem:[%s5979_s9 + $0x200] sm:$0xff]  ;;  %v4002_v22 = vld [vmem:[%s5979_s9 + $0x190] sm:$0xff] }
 0x5ff   : > { %v2546_v26 = vpack.c.bf16 %v2255_v24, %v2254_v23  ;;  %v5436_v8 = vpop.f32.mrb[31].mxu0  ;;  %v3990_v23 = vld [vmem:[%s5979_s9 + $0x130] sm:$0xff]  ;;  %v4017_v24 = vld [vmem:[%s5979_s9 + $0x208] sm:$0xff] }
 0x600   : > { %2570 = vrot.lane.b32.xlu1 %v2547_v25, %s4670_s18  ;;  %v4018_v25 = vld [vmem:[%s5979_s9 + $0x210] sm:$0xff] }
 0x601   : > { %2568 = vrot.lane.b32.xlu0 %v2546_v26, %s4670_s18  ;;  %v4003_v26 = vld [vmem:[%s5979_s9 + $0x198] sm:$0xff] }
 0x65a   : > { %v2559_v1 = vpop.permute.xlu1 %2558 }
 0x65b   : > { %2582 = vst.msk [vmem:[#allocation3 + $0x8] sm:$0xff] %vm2580_vm9, %v2559_v1  ;;  %v2557_v27 = vpop.permute.xlu0 %2556  ;;  %v4004_v1 = vld [vmem:[%s5979_s9 + $0x1a0] sm:$0xff] }
 0x65c   : > { %2581 = vst.msk [vmem:[#allocation3] sm:$0xff] %vm2580_vm9, %v2557_v27  ;;  %v3991_v27 = vld [vmem:[%s5979_s9 + $0x138] sm:$0xff] }
 0x662   : > { %v2563_v28 = vpop.permute.xlu1 %2562  ;;  %v5312_v29 = vld [vmem:[#allocation3 + $0x8] sm:$0xff] }
 0x663   : > { %2584 = vst.msk [vmem:[#allocation3 + $0x18] sm:$0xff] %vm2580_vm9, %v2563_v28  ;;  %2688 = vrot.lane.b32.xlu1 %v5312_v29, %s4669_s22  ;;  %v2561_v2 = vpop.permute.xlu0 %2560  ;;  %v5317_v30 = vld [vmem:[#allocation3] sm:$0xff] }
 0x664   : > { %2583 = vst.msk [vmem:[#allocation3 + $0x10] sm:$0xff] %vm2580_vm9, %v2561_v2  ;;  %2686 = vrot.lane.b32.xlu0 %v5317_v30, %s4669_s22  ;;  %v3992_v28 = vld [vmem:[%s5979_s9 + $0x140] sm:$0xff]  ;;  %v4019_v2 = vld [vmem:[%s5979_s9 + $0x218] sm:$0xff] }
 0x66a   : > { %v2567_v31 = vpop.permute.xlu1 %2566  ;;  %v5322_v32 = vld [vmem:[#allocation3 + $0x18] sm:$0xff] }
 0x66b   : > { %2586 = vst.msk [vmem:[#allocation3 + $0x28] sm:$0xff] %vm2580_vm9, %v2567_v31  ;;  %2692 = vrot.lane.b32.xlu1 %v5322_v32, %s4669_s22  ;;  %v2565_v4 = vpop.permute.xlu0 %2564  ;;  %v5327_v33 = vld [vmem:[#allocation3 + $0x10] sm:$0xff]  ;;  %v4020_v31 = vld [vmem:[%s5979_s9 + $0x220] sm:$0xff] }
 0x66c   : > { %2585 = vst.msk [vmem:[#allocation3 + $0x20] sm:$0xff] %vm2580_vm9, %v2565_v4  ;;  %2690 = vrot.lane.b32.xlu0 %v5327_v33, %s4669_s22  ;;  %v4005_v4 = vld [vmem:[%s5979_s9 + $0x1a8] sm:$0xff] }
 0x672   : > { %v2571_v34 = vpop.permute.xlu1 %2570  ;;  %v5332_v35 = vld [vmem:[#allocation3 + $0x28] sm:$0xff] }
 0x673   : > { %2588 = vst.msk [vmem:[#allocation3 + $0x38] sm:$0xff] %vm2580_vm9, %v2571_v34  ;;  %2696 = vrot.lane.b32.xlu1 %v5332_v35, %s4669_s22  ;;  %v2569_v5 = vpop.permute.xlu0 %2568  ;;  %v5337_v36 = vld [vmem:[#allocation3 + $0x20] sm:$0xff]  ;;  %v4006_v34 = vld [vmem:[%s5979_s9 + $0x1b0] sm:$0xff] }
 0x674   : > { %2587 = vst.msk [vmem:[#allocation3 + $0x30] sm:$0xff] %vm2580_vm9, %v2569_v5  ;;  %2694 = vrot.lane.b32.xlu0 %v5337_v36, %s4669_s22  ;;  %v3993_v5 = vld [vmem:[%s5979_s9 + $0x148] sm:$0xff] }
 0x67a   : > { %v5345_v38 = vld [vmem:[#allocation3 + $0x38] sm:$0xff] }
 0x67b   : > { %2700 = vrot.lane.b32.xlu1 %v5345_v38, %s4669_s22  ;;  %v5349_v39 = vld [vmem:[#allocation3 + $0x30] sm:$0xff] }
 0x67c   : > { %2698 = vrot.lane.b32.xlu0 %v5349_v39, %s4669_s22  ;;  %s452_s22 = scalar_lea.vmem %s5983_s13, %s6005_s28 }
 0x67f   : > { %3019 = vrot.lane.b32.xlu1 %v5312_v29, %s4671_s23 }
 0x680   : > { %3017 = vrot.lane.b32.xlu0 %v5317_v30, %s4671_s23 }
 0x683   : > { %3023 = vrot.lane.b32.xlu1 %v5322_v32, %s4671_s23 }
 0x684   : > { %3021 = vrot.lane.b32.xlu0 %v5327_v33, %s4671_s23 }
 0x687   : > { %3027 = vrot.lane.b32.xlu1 %v5332_v35, %s4671_s23 }
 0x688   : > { %3025 = vrot.lane.b32.xlu0 %v5337_v36, %s4671_s23 }
 0x68b   : > { %3031 = vrot.lane.b32.xlu1 %v5345_v38, %s4671_s23 }
 0x68c   : > { %3029 = vrot.lane.b32.xlu0 %v5349_v39, %s4671_s23 }
 0x68f   : > { %2298 = vperm.xlu1 %4573, %v3897_v42  }
 0x690   : > { %2293 = vperm.xlu0 %4572, %v3896_v17   ;;  %v3994_v17 = vld [vmem:[%s5979_s9 + $0x150] sm:$0xff] }
 0x693   : > { %2308 = vperm.xlu1 %4573, %v3899_v46   ;;  %v4021_v46 = vld [vmem:[%s5979_s9 + $0x228] sm:$0xff] }
 0x694   : > { %2303 = vperm.xlu0 %4572, %v3898_v51   ;;  %v4022_v51 = vld [vmem:[%s5979_s9 + $0x230] sm:$0xff] }
 0x697   : > { %2318 = vperm.xlu1 %4573, %v3901_v16   ;;  %v4007_v16 = vld [vmem:[%s5979_s9 + $0x1b8] sm:$0xff] }
 0x698   : > { %2313 = vperm.xlu0 %4572, %v3900_v44  }
 0x69b   : > { %2328 = vperm.xlu1 %4573, %v3903_v49  }
 0x69c   : > { %2323 = vperm.xlu0 %4572, %v3902_v61   ;;  %v4008_v61 = vld [vmem:[%s5979_s9 + $0x1c0] sm:$0xff] }
 0x69f   : > { %2338 = vperm.xlu1 %4573, %v3905_v54   ;;  %v3995_v54 = vld [vmem:[%s5979_s9 + $0x158] sm:$0xff] }
 0x6a0   : > { %2333 = vperm.xlu0 %4572, %v3904_v52   ;;  %v3996_v52 = vld [vmem:[%s5979_s9 + $0x160] sm:$0xff] }
 0x6a3   : > { %2348 = vperm.xlu1 %4573, %v3907_v15  }
 0x6a4   : > { %2343 = vperm.xlu0 %4572, %v3906_v55  }
 0x6a7   : > { %2358 = vperm.xlu1 %4573, %v3909_v50   ;;  %v4024_v50 = vld [vmem:[%s5979_s9 + $0x240] sm:$0xff] }
 0x6a8   : > { %2353 = vperm.xlu0 %4572, %v3908_v6   ;;  %v4009_v6 = vld [vmem:[%s5979_s9 + $0x1c8] sm:$0xff] }
 0x6ab   : > { %2368 = vperm.xlu1 %4573, %v3911_v9   ;;  %v4010_v9 = vld [vmem:[%s5979_s9 + $0x1d0] sm:$0xff] }
 0x6ac   : > { %2363 = vperm.xlu0 %4572, %v3910_v10   ;;  %v3997_v10 = vld [vmem:[%s5979_s9 + $0x168] sm:$0xff] }
 0x6af   : > { %3178 = vperm.xlu1 %4573, %v3985_v11  }
 0x6b0   : > { %3173 = vperm.xlu0 %4572, %v3984_v12  }
 0x6b3   : > { %3188 = vperm.xlu1 %4573, %v3987_v59   ;;  %v3998_v59 = vld [vmem:[%s5979_s9 + $0x170] sm:$0xff] }
 0x6b4   : > { %3183 = vperm.xlu0 %4572, %v3986_v14   ;;  %v4025_v14 = vld [vmem:[%s5979_s9 + $0x248] sm:$0xff] }
 0x6b7   : > { %3318 = vperm.xlu1 %4573, %v4000_v18  }
 0x6b8   : > { %3193 = vperm.xlu0 %4572, %v3988_v19   ;;  %v4635_v19 = vld [vmem:[%s5978_s8 + $0x48] sm:$0xff]  }
 0x6bb   : > { %3198 = vperm.xlu1 %4573, %v3989_v20   ;;  %v4026_v20 = vld [vmem:[%s5979_s9 + $0x250] sm:$0xff] }
 0x6bc   : > { %3323 = vperm.xlu0 %4572, %v4001_v60  }
 0x6bf   : > { %3431 = vperm.xlu1 %4573, %v4016_v21   ;;  %v4011_v21 = vld [vmem:[%s5979_s9 + $0x1d8] sm:$0xff] }
 0x6c0   : > { %3328 = vperm.xlu0 %4572, %v4002_v22   ;;  %v4636_v22 = vld [vmem:[%s5978_s8 + $0x50] sm:$0xff]  }
 0x6c3   : > { %3203 = vperm.xlu1 %4573, %v3990_v23   ;;  %v4012_v23 = vld [vmem:[%s5979_s9 + $0x1e0] sm:$0xff] }
 0x6c4   : > { %3436 = vperm.xlu0 %4572, %v4017_v24  }
 0x6c7   : > { %3441 = vperm.xlu1 %4573, %v4018_v25   ;;  %v3999_v25 = vld [vmem:[%s5979_s9 + $0x178] sm:$0xff] }
 0x6c8   : > { %3333 = vperm.xlu0 %4572, %v4003_v26   ;;  %v4013_v26 = vld [vmem:[%s5979_s9 + $0x1e8] sm:$0xff] }
 0x6cb   : > { %3338 = vperm.xlu1 %4573, %v4004_v1  }
 0x6cc   : > { %3208 = vperm.xlu0 %4572, %v3991_v27   ;;  %v4027_v27 = vld [vmem:[%s5979_s9 + $0x258] sm:$0xff] }
 0x6cf   : > { %3213 = vperm.xlu1 %4573, %v3992_v28   ;;  %v4014_v28 = vld [vmem:[%s5979_s9 + $0x1f0] sm:$0xff] }
 0x6d0   : > { %3446 = vperm.xlu0 %4572, %v4019_v2  }
 0x6d3   : > { %3451 = vperm.xlu1 %4573, %v4020_v31   ;;  %v4028_v31 = vld [vmem:[%s5979_s9 + $0x260] sm:$0xff] }
 0x6d4   : > { %3343 = vperm.xlu0 %4572, %v4005_v4  }
 0x6d5   : > { %v2689_v42 = vpop.permute.xlu1 %2688 }
 0x6d6   : > { %v2687_v37 = vpop.permute.xlu0 %2686 }
 0x6d7   : > { %3348 = vperm.xlu1 %4573, %v4006_v34   ;;  %4364 = vmatprep.subr.bf16.mxu0 %v2687_v37  ;;  %v4015_v34 = vld [vmem:[%s5979_s9 + $0x1f8] sm:$0xff] }
 0x6d8   : > { %3218 = vperm.xlu0 %4572, %v3993_v5   ;;  %4365 = vmatpush3.bf16.msra.mxu0 %v2687_v37  ;;  %v4029_v5 = vld [vmem:[%s5979_s9 + $0x268] sm:$0xff]  ;;  %v4640_v37 = vld [vmem:[%s5978_s8 + $0x70] sm:$0xff]  }
 0x6d9   : > { %4366 = vmatprep.subr.bf16.mxu0 %v2689_v42 }
 0x6db   : > { %3223 = vperm.xlu1 %4573, %v3994_v17   ;;  %v4030_v17 = vld [vmem:[%s5979_s9 + $0x270] sm:$0xff] }
 0x6dc   : > { %3456 = vperm.xlu0 %4572, %v4021_v46   ;;  %4367 = vmatpush3.bf16.msra.mxu0 %v2689_v42 }
 0x6dd   : > { %v2693_v49 = vpop.permute.xlu1 %2692 }
 0x6de   : > { %v2691_v44 = vpop.permute.xlu0 %2690 }
 0x6df   : > { %3461 = vperm.xlu1 %4573, %v4022_v51   ;;  %4368 = vmatprep.subr.bf16.mxu0 %v2691_v44  ;;  %v4642_v51 = vld [vmem:[%s5978_s8] sm:$0xff]  }
 0x6e0   : > { %3353 = vperm.xlu0 %4572, %v4007_v16   ;;  %4369 = vmatpush3.bf16.msra.mxu0 %v2691_v44 }
 0x6e1   : > { %4370 = vmatprep.subr.bf16.mxu0 %v2693_v49 }
 0x6e3   : > { %3358 = vperm.xlu1 %4573, %v4008_v61  }
 0x6e4   : > { %3228 = vperm.xlu0 %4572, %v3995_v54   ;;  %4371 = vmatpush3.bf16.msra.mxu0 %v2693_v49 }
 0x6e5   : > { %v2697_v55 = vpop.permute.xlu1 %2696 }
 0x6e6   : > { %v2695_v15 = vpop.permute.xlu0 %2694 }
 0x6e7   : > { %3233 = vperm.xlu1 %4573, %v3996_v52   ;;  %4372 = vmatprep.subr.bf16.mxu0 %v2695_v15 }
 0x6e8   : > { %3466 = vperm.xlu0 %4572, %v4023_v63   ;;  %4373 = vmatpush3.bf16.msra.mxu0 %v2695_v15  ;;  %v4645_v15 = vld [vmem:[%s5978_s8 + $0x10] sm:$0xff]  }
 0x6e9   : > { %4374 = vmatprep.subr.bf16.mxu0 %v2697_v55 }
 0x6eb   : > { %3471 = vperm.xlu1 %4573, %v4024_v50  }
 0x6ec   : > { %3363 = vperm.xlu0 %4572, %v4009_v6   ;;  %4375 = vmatpush3.bf16.msra.mxu0 %v2697_v55 }
 0x6ed   : > { %v2701_v12 = vpop.permute.xlu1 %2700 }
 0x6ee   : > { %v2699_v11 = vpop.permute.xlu0 %2698 }
 0x6ef   : > { %3368 = vperm.xlu1 %4573, %v4010_v9   ;;  %4376 = vmatprep.subr.bf16.mxu0 %v2699_v11 }
 0x6f0   : > { %3238 = vperm.xlu0 %4572, %v3997_v10   ;;  %4377 = vmatpush3.bf16.msra.mxu0 %v2699_v11 }
 0x6f1   : > { %4378 = vmatprep.subr.bf16.mxu0 %v2701_v12  ;;  %v5561_v60 = vpop.permute.xlu1 %3019 }
 0x6f2   : > { %v5552_v18 = vpop.permute.xlu0 %3017 }
 0x6f3   : > { %3243 = vperm.xlu1 %4573, %v3998_v59   ;;  %4460 = vmatprep.subr.bf16.mxu1 %v5552_v18 }
 0x6f4   : > { %3476 = vperm.xlu0 %4572, %v4025_v14   ;;  %4379 = vmatpush3.bf16.msra.mxu0 %v2701_v12  ;;  %v4648_v12 = vld [vmem:[%s5978_s8 + $0x20] sm:$0xff]  }
 0x6f5   : > { %4468 = vmatpush3.bf16.msra.mxu1 %v5552_v18  ;;  %4396 = vmatprep.subr.bf16.mxu0 %v5317_v30  ;;  %v5591_v1 = vpop.permute.xlu1 %3023 }
 0x6f6   : > { %4461 = vmatprep.subr.bf16.mxu1 %v5561_v60  ;;  %v5576_v24 = vpop.permute.xlu0 %3021 }
 0x6f7   : > { %3481 = vperm.xlu1 %4573, %v4026_v20   ;;  %4381 = vmatmul.mubr.bf16.vlgmr.msra.gmra.mrb[32].mxu0 %v4635_v19 }
 0x6f8   : > { %3373 = vperm.xlu0 %4572, %v4011_v21   ;;  %4397 = vmatpush3.bf16.msra.mxu0 %v5317_v30  ;;  %v4637_v30 = vld [vmem:[%s5978_s8 + $0x58] sm:$0xff]   ;;  %v4652_v21 = vld [vmem:[%s5978_s8 + $0x30] sm:$0xff]  }
 0x6f9   : > { %4469 = vmatpush3.bf16.msra.mxu1 %v5561_v60  ;;  %4398 = vmatprep.subr.bf16.mxu0 %v5312_v29  ;;  %v5617_v4 = vpop.permute.xlu1 %3027 }
 0x6fa   : > { %4462 = vmatprep.subr.bf16.mxu1 %v5576_v24  ;;  %4384 = vmatprep.mubr.bf16.mxu0 %v4636_v22  ;;  %v5606_v2 = vpop.permute.xlu0 %3025 }
 0x6fb   : > { %3378 = vperm.xlu1 %4573, %v4012_v23  }
 0x6fc   : > { %3248 = vperm.xlu0 %4572, %v3999_v25   ;;  %4399 = vmatpush3.bf16.msra.mxu0 %v5312_v29  ;;  %v4638_v29 = vld [vmem:[%s5978_s8 + $0x60] sm:$0xff]  }
 0x6fd   : > { %4470 = vmatpush3.bf16.msra.mxu1 %v5576_v24  ;;  %4400 = vmatprep.subr.bf16.mxu0 %v5327_v33  ;;  %v5643_v46 = vpop.permute.xlu1 %3031 }
 0x6fe   : > { %4463 = vmatprep.subr.bf16.mxu1 %v5591_v1  ;;  %v5636_v42 = vpop.permute.xlu0 %3029 }
 0x6ff   : > { %3383 = vperm.xlu1 %4573, %v4013_v26   ;;  %4385 = vmatmul.mubr.bf16.gmra.mrb[36].mxu0 %v4637_v30 }
 0x700   : > { %3486 = vperm.xlu0 %4572, %v4027_v27   ;;  %4401 = vmatpush3.bf16.msra.mxu0 %v5327_v33  ;;  %v4639_v33 = vld [vmem:[%s5978_s8 + $0x68] sm:$0xff]  }
 0x701   : > { %4471 = vmatpush3.bf16.msra.mxu1 %v5591_v1  ;;  %4402 = vmatprep.subr.bf16.mxu0 %v5322_v32 }
 0x702   : > { %4464 = vmatprep.subr.bf16.mxu1 %v5606_v2  ;;  %4388 = vmatprep.mubr.bf16.mxu0 %v4638_v29 }
 0x703   : > { %3388 = vperm.xlu1 %4573, %v4014_v28  }
 0x704   : > { %3491 = vperm.xlu0 %4572, %v4028_v31   ;;  %4403 = vmatpush3.bf16.msra.mxu0 %v5322_v32  ;;  %v4031_v32 = vld [vmem:[%s5979_s9 + $0x278] sm:$0xff] }
 0x705   : > { %4472 = vmatpush3.bf16.msra.mxu1 %v5606_v2  ;;  %4404 = vmatprep.subr.bf16.mxu0 %v5337_v36 }
 0x706   : > { %4465 = vmatprep.subr.bf16.mxu1 %v5617_v4 }
 0x707   : > { %3393 = vperm.xlu1 %4573, %v4015_v34   ;;  %4389 = vmatmul.mubr.bf16.gmra.mrb[40].mxu0 %v4639_v33 }
 0x708   : > { %3496 = vperm.xlu0 %4572, %v4029_v5   ;;  %4405 = vmatpush3.bf16.msra.mxu0 %v5337_v36  ;;  %v4641_v36 = vld [vmem:[%s5978_s8 + $0x78] sm:$0xff]  }
 0x709   : > { %4473 = vmatpush3.bf16.msra.mxu1 %v5617_v4  ;;  %4406 = vmatprep.subr.bf16.mxu0 %v5332_v35 }
 0x70a   : > { %4466 = vmatprep.subr.bf16.mxu1 %v5636_v42  ;;  %4392 = vmatprep.mubr.bf16.mxu0 %v4640_v37 }
 0x70b   : > { %3506 = vperm.xlu1 %4573, %v4031_v32  }
 0x70c   : > { %3501 = vperm.xlu0 %4572, %v4030_v17   ;;  %4407 = vmatpush3.bf16.msra.mxu0 %v5332_v35  ;;  %v4647_v35 = vld [vmem:[%s5978_s8 + $0x98] sm:$0xff]  }
 0x70d   : > { %4474 = vmatpush3.bf16.msra.mxu1 %v5636_v42  ;;  %4408 = vmatprep.subr.bf16.mxu0 %v5349_v39 }
 0x70e   : > { %4467 = vmatprep.subr.bf16.mxu1 %v5643_v46  ;;  %v2299_v16 = vpop.permute.xlu1 %2298 }
 0x70f   : > { %v5657_v44 = vadd.f32 %v5373_v45, %v2299_v16  ;;  %4393 = vmatmul.mubr.bf16.gmra.mrb[44].mxu0 %v4641_v36  ;;  %v2294_v49 = vpop.permute.xlu0 %2293  ;;  %v4649_v45 = vld [vmem:[%s5978_s8 + $0xa0] sm:$0xff]  }
 0x710   : > { %v5660_v61 = vadd.f32 %v5362_v41, %v2294_v49  ;;  %4409 = vmatpush3.bf16.msra.mxu0 %v5349_v39  ;;  %4412 = vmatprep.mubr.bf16.mxu0 %v4642_v51  ;;  %v4643_v39 = vld [vmem:[%s5978_s8 + $0x8] sm:$0xff]  }
 0x711   : > { %4475 = vmatpush3.bf16.msra.mxu1 %v5643_v46  ;;  %4410 = vmatprep.subr.bf16.mxu0 %v5345_v38 }
 0x712   : > { %v2309_v54 = vpop.permute.xlu1 %2308 }
 0x713   : > { %v5672_v52 = vadd.f32 %v5371_v43, %v2309_v54  ;;  %v2304_v41 = vpop.permute.xlu0 %2303 }
 0x714   : > { %v5678_v63 = vadd.f32 %v5359_v40, %v2304_v41  ;;  %4411 = vmatpush3.bf16.msra.mxu0 %v5345_v38  ;;  %4449 = vmatmul.mubr.bf16.vlgmr.msra.gmra.mrb[32].mxu1 %v4647_v35  ;;  %v4651_v38 = vld [vmem:[%s5978_s8 + $0xa8] sm:$0xff]   ;;  %v4653_v40 = vld [vmem:[%s5978_s8 + $0xb0] sm:$0xff]  }
 0x715   : > { %4428 = vmatprep.subr.bf16.mxu0 %v5552_v18  ;;  %4452 = vmatprep.mubr.bf16.mxu1 %v4649_v45 }
 0x716   : > { %v2319_v43 = vpop.permute.xlu1 %2318 }
 0x717   : > { %v5686_v55 = vadd.f32 %v5393_v58, %v2319_v43  ;;  %4413 = vmatmul.mubr.bf16.vlgmr.msra.gmra.mrb[32].mxu0 %v4643_v39  ;;  %v2314_v50 = vpop.permute.xlu0 %2313 }
 0x718   : > { %v5689_v6 = vadd.f32 %v5386_v56, %v2314_v50  ;;  %4429 = vmatpush3.bf16.msra.mxu0 %v5552_v18  ;;  %4416 = vmatprep.mubr.bf16.mxu0 %v4645_v15  ;;  %v4646_v56 = vld [vmem:[%s5978_s8 + $0x18] sm:$0xff]  }
 0x719   : > { %4430 = vmatprep.subr.bf16.mxu0 %v5561_v60 }
 0x71a   : > { %v2329_v58 = vpop.permute.xlu1 %2328 }
 0x71b   : > { %v5700_v9 = vadd.f32 %v5391_v47, %v2329_v58  ;;  %v2324_v10 = vpop.permute.xlu0 %2323 }
 0x71c   : > { %v5706_v11 = vadd.f32 %v5381_v53, %v2324_v10  ;;  %4431 = vmatpush3.bf16.msra.mxu0 %v5561_v60  ;;  %4453 = vmatmul.mubr.bf16.gmra.mrb[36].mxu1 %v4651_v38  ;;  %v4655_v53 = vld [vmem:[%s5978_s8 + $0xb8] sm:$0xff]   ;;  %v4650_v60 = vld [vmem:[%s5978_s8 + $0x28] sm:$0xff]  }
 0x71d   : > { %4432 = vmatprep.subr.bf16.mxu0 %v5576_v24  ;;  %4456 = vmatprep.mubr.bf16.mxu1 %v4653_v40 }
 0x71e   : > { %v2339_v47 = vpop.permute.xlu1 %2338 }
 0x71f   : > { %v5714_v59 = vadd.f32 %v5416_v0, %v2339_v47  ;;  %4417 = vmatmul.mubr.bf16.gmra.mrb[36].mxu0 %v4646_v56  ;;  %v2334_v14 = vpop.permute.xlu0 %2333 }
 0x720   : > { %v5717_v18 = vadd.f32 %v5406_v57, %v2334_v14  ;;  %4433 = vmatpush3.bf16.msra.mxu0 %v5576_v24  ;;  %4420 = vmatprep.mubr.bf16.mxu0 %v4648_v12 }
 0x721   : > { %4434 = vmatprep.subr.bf16.mxu0 %v5591_v1 }
 0x722   : > { %v2349_v19 = vpop.permute.xlu1 %2348 }
 0x723   : > { %v5725_v20 = vadd.f32 %v5411_v62, %v2349_v19  ;;  %v2344_v0 = vpop.permute.xlu0 %2343 }
 0x724   : > { %v5731_v57 = vadd.f32 %v5401_v13, %v2344_v0  ;;  %4435 = vmatpush3.bf16.msra.mxu0 %v5591_v1  ;;  %4457 = vmatmul.mubr.bf16.gmra.mrb[40].mxu1 %v4655_v53 }
 0x725   : > { %4436 = vmatprep.subr.bf16.mxu0 %v5606_v2 }
 0x726   : > { %v2359_v22 = vpop.permute.xlu1 %2358 }
 0x727   : > { %v5739_v62 = vadd.f32 %v5436_v8, %v2359_v22  ;;  %4421 = vmatmul.mubr.bf16.gmra.mrb[40].mxu0 %v4650_v60  ;;  %v2354_v23 = vpop.permute.xlu0 %2353  ;;  %v4654_v8 = vld [vmem:[%s5978_s8 + $0x38] sm:$0xff]  }
 0x728   : > { %v5742_v24 = vadd.f32 %v5429_v3, %v2354_v23  ;;  %4437 = vmatpush3.bf16.msra.mxu0 %v5606_v2  ;;  %4424 = vmatprep.mubr.bf16.mxu0 %v4652_v21  ;;  %v4656_v3 = vld [vmem:[%s5978_s8 + $0x80] sm:$0xff]  }
 0x729   : > { %4438 = vmatprep.subr.bf16.mxu0 %v5617_v4 }
 0x72a   : > { %v2369_v13 = vpop.permute.xlu1 %2368 }
 0x72b   : > { %v5747_v25 = vadd.f32 %v5434_v7, %v2369_v13  ;;  %v2364_v30 = vpop.permute.xlu0 %2363  ;;  %v4657_v7 = vld [vmem:[%s5978_s8 + $0x88] sm:$0xff]  }
 0x72c   : > { %v5753_v26 = vadd.f32 %v5424_v48, %v2364_v30  ;;  %4439 = vmatpush3.bf16.msra.mxu0 %v5617_v4 }
 0x72d   : > { %4440 = vmatprep.subr.bf16.mxu0 %v5636_v42 }
 0x72e   : > { %v5770_v27 = vpop.permute.xlu1 %3178 }
 0x72f   : > { %4425 = vmatmul.mubr.bf16.gmra.mrb[44].mxu0 %v4654_v8  ;;  %v5766_v48 = vpop.permute.xlu0 %3173 }
 0x730   : > { %4441 = vmatpush3.bf16.msra.mxu0 %v5636_v42  ;;  %4444 = vmatprep.mubr.bf16.mxu0 %v4656_v3 }
 0x731   : > { %4442 = vmatprep.subr.bf16.mxu0 %v5643_v46 }
 0x732   : > { %v5772_v28 = vpop.permute.xlu1 %3188 }
 0x733   : > { %v5768_v1 = vpop.permute.xlu0 %3183 }
 0x734   : > { %4443 = vmatpush3.bf16.msra.mxu0 %v5643_v46 }
 0x736   : > { %v5776_v31 = vpop.permute.xlu1 %3318 }
 0x737   : > { %4445 = vmatmul.mubr.bf16.vlgmr.msra.gmra.mrb[32].mxu0 %v4657_v7  ;;  %v3194_v29 = vpop.permute.xlu0 %3193 }
 0x73a   : > { %v3199_v4 = vpop.permute.xlu1 %3198 }
 0x73b   : > { %v5774_v2 = vpop.permute.xlu0 %3323 }
 0x73e   : > { %v5782_v5 = vpop.permute.xlu1 %3431 }
 0x73f   : > { %v5778_v33 = vpop.permute.xlu0 %3328 }
 0x742   : > { %v3204_v32 = vpop.permute.xlu1 %3203 }
 0x743   : > { %v5780_v34 = vpop.permute.xlu0 %3436 }
 0x744   : > { %5984 = vst [vmem:[#allocation5_spill] sm:$0xff] %v5780_v34 }
 0x746   : > { %v5786_v17 = vpop.permute.xlu1 %3441 }
 0x747   : > { %v5784_v37 = vpop.permute.xlu0 %3333 }
 0x74a   : > { %v5790_v36 = vpop.permute.xlu1 %3338 }
 0x74b   : > { %v3209_v42 = vpop.permute.xlu0 %3208 }
 0x74e   : > { %v3214_v16 = vpop.permute.xlu1 %3213 }
 0x74f   : > { %v5788_v46 = vpop.permute.xlu0 %3446 }
 0x750   : > { %5985 = vst [vmem:[#allocation6_spill] sm:$0xff] %v5788_v46 }
 0x752   : > { %v5794_v35 = vpop.permute.xlu1 %3451 }
 0x753   : > { %v5792_v51 = vpop.permute.xlu0 %3343  ;;  %5987 = vst [vmem:[#allocation8_spill] sm:$0xff] %v5794_v35 }
 0x754   : > { %5986 = vst [vmem:[#allocation7_spill] sm:$0xff] %v5792_v51 }
 0x756   : > { %v5798_v54 = vpop.permute.xlu1 %3348 }
 0x757   : > { %v3219_v49 = vpop.permute.xlu0 %3218 }
 0x75a   : > { %v3224_v39 = vpop.permute.xlu1 %3223 }
 0x75b   : > { %v5796_v45 = vpop.permute.xlu0 %3456 }
 0x75c   : > { %5988 = vst [vmem:[#allocation9_spill] sm:$0xff] %v5796_v45 }
 0x75e   : > { %v5802_v43 = vpop.permute.xlu1 %3461 }
 0x75f   : > { %v5800_v41 = vpop.permute.xlu0 %3353  ;;  %5990 = vst [vmem:[#allocation11_spill] sm:$0xff] %v5802_v43 }
 0x760   : > { %5989 = vst [vmem:[#allocation10_spill] sm:$0xff] %v5800_v41 }
 0x762   : > { %v5806_v56 = vpop.permute.xlu1 %3358 }
 0x763   : > { %v3229_v15 = vpop.permute.xlu0 %3228  ;;  %5992 = vst [vmem:[#allocation13_spill] sm:$0xff] %v5806_v56 }
 0x766   : > { %v3234_v53 = vpop.permute.xlu1 %3233 }
 0x767   : > { %v5804_v50 = vpop.permute.xlu0 %3466 }
 0x768   : > { %5991 = vst [vmem:[#allocation12_spill] sm:$0xff] %v5804_v50 }
 0x76a   : > { %v5812_v43 = vpop.permute.xlu1 %3471 }
 0x76b   : > { %v5808_v12 = vpop.permute.xlu0 %3363 }
 0x76c   : > { %5993 = vst [vmem:[#allocation14_spill] sm:$0xff] %v5808_v12 }
 0x76f   : > { %v5810_v21 = vpop.permute.xlu0 %3238 }
 0x773   : > { %v5814_v35 = vpop.permute.xlu0 %3476 }
 0x7e7   : > { %v4450_v38 = vpop.f32.mrb[32].mxu1 }
 0x7e8   : > { %v3091_v40 = vpop.f32.mrb[33].mxu1 }
 0x7e9   : > { %v4451_v58 = vpop.f32.mrb[34].mxu1 }
 0x7ea   : > { %v3094_v10 = vpop.f32.mrb[35].mxu1 }
 0x7ef   : > { %v4454_v47 = vpop.f32.mrb[36].mxu1 }
 0x7f0   : > { %v3107_v14 = vpop.f32.mrb[37].mxu1 }
 0x7f1   : > { %v4455_v19 = vpop.f32.mrb[38].mxu1 }
 0x7f2   : > { %v4418_v0 = vpop.f32.mrb[36].mxu0  ;;  %v3110_v60 = vpop.f32.mrb[39].mxu1 }
 0x7f3   : > { %v4476_v22 = vadd.f32 %v4450_v38, %v4418_v0  ;;  %v2905_v23 = vpop.f32.mrb[37].mxu0 }
 0x7f4   : > { %v4477_v13 = vadd.f32 %v3091_v40, %v2905_v23  ;;  %v4419_v30 = vpop.f32.mrb[38].mxu0 }
 0x7f5   : > { %v3257_v8 = vadd.f32 %v4476_v22, %v3204_v32  ;;  %v4478_v3 = vadd.f32 %v4451_v58, %v4419_v30  ;;  %v2908_v7 = vpop.f32.mrb[39].mxu0 }
 0x7f6   : > { %v3255_v50 = vadd.f32 %v4477_v13, %v3194_v29  ;;  %v4479_v45 = vadd.f32 %v3094_v10, %v2908_v7 }
 0x7f7   : > { %v3273_v41 = vmax.f32 %v3257_v8, 0.0  ;;  %v3258_v56 = vadd.f32 %v4478_v3, %v3209_v42  ;;  %v4458_v12 = vpop.f32.mrb[40].mxu1  ;;  %v5828_v8 = vpop.permute.xlu0 %3373 }
 0x7f8   : > { %v3271_v46 = vmax.f32 %v3255_v50, 0.0  ;;  %v3256_v34 = vadd.f32 %v4479_v45, %v3199_v4  ;;  %v3123_v51 = vpop.f32.mrb[41].mxu1 }
 0x7f9   : > { %v5817_v38 = vadd.f32 %v3273_v41, %v5706_v11  ;;  %v3274_v40 = vmax.f32 %v3258_v56, 0.0  ;;  %v4459_v0 = vpop.f32.mrb[42].mxu1  ;;  %v5826_v56 = vpop.permute.xlu1 %3368 }
 0x7fa   : > { %v3287_v32 = vadd.f32 %v3271_v46, %v5689_v6  ;;  %v3272_v58 = vmax.f32 %v3256_v34, 0.0  ;;  %v4422_v29 = vpop.f32.mrb[40].mxu0  ;;  %v3126_v10 = vpop.f32.mrb[43].mxu1 }
 0x7fb   : > { %v5821_v42 = vadd.f32 %v3274_v40, %v5700_v9  ;;  %v4480_v22 = vadd.f32 %v4454_v47, %v4422_v29  ;;  %v2921_v23 = vpop.f32.mrb[41].mxu0 }
 0x7fc   : > { %v5824_v4 = vadd.f32 %v3272_v58, %v5686_v55  ;;  %v4481_v45 = vadd.f32 %v3107_v14, %v2921_v23  ;;  %v4423_v50 = vpop.f32.mrb[42].mxu0  ;;  %v3249_v23 = vpop.permute.xlu0 %3248 }
 0x7fd   : > { %v3261_v13 = vadd.f32 %v4480_v22, %v3224_v39  ;;  %v4482_v11 = vadd.f32 %v4455_v19, %v4423_v50  ;;  %v2924_v41 = vpop.f32.mrb[43].mxu0  ;;  %v3244_v40 = vpop.permute.xlu1 %3243 }
 0x7fe   : > { %v3259_v30 = vadd.f32 %v4481_v45, %v3214_v16  ;;  %v4483_v6 = vadd.f32 %v3110_v60, %v2924_v41 }
 0x7ff   : > { %v3277_v34 = vmax.f32 %v3261_v13, 0.0  ;;  %v3262_v46 = vadd.f32 %v4482_v11, %v3229_v15 }
 0x800   : > { %v3275_v9 = vmax.f32 %v3259_v30, 0.0  ;;  %v3260_v3 = vadd.f32 %v4483_v6, %v3219_v49 }
 0x801   : > { %v5831_v47 = vadd.f32 %v3277_v34, %v5731_v57  ;;  %v3278_v55 = vmax.f32 %v3262_v46, 0.0 }
 0x802   : > { %v5834_v14 = vadd.f32 %v3275_v9, %v5717_v18  ;;  %v3276_v39 = vmax.f32 %v3260_v3, 0.0  ;;  %v4426_v19 = vpop.f32.mrb[44].mxu0 }
 0x803   : > { %v5837_v7 = vadd.f32 %v3278_v55, %v5725_v20  ;;  %v4484_v16 = vadd.f32 %v4458_v12, %v4426_v19  ;;  %v2937_v60 = vpop.f32.mrb[45].mxu0  ;;  %v3482_v55 = vpop.permute.xlu1 %3481 }
 0x804   : > { %v5840_v15 = vadd.f32 %v3276_v39, %v5714_v59  ;;  %v4485_v58 = vadd.f32 %v3123_v51, %v2937_v60  ;;  %v4427_v49 = vpop.f32.mrb[46].mxu0 }
 0x805   : > { %v3265_v29 = vadd.f32 %v4484_v16, %v3244_v40  ;;  %v4486_v57 = vadd.f32 %v4459_v0, %v4427_v49  ;;  %v2940_v22 = vpop.f32.mrb[47].mxu0  ;;  %v5873_v49 = vpop.permute.xlu0 %3486 }
 0x806   : > { %v3263_v45 = vadd.f32 %v4485_v58, %v3234_v53  ;;  %v4487_v18 = vadd.f32 %v3126_v10, %v2940_v22  ;;  %v5998_v22 = vld [vmem:[#allocation11_spill] sm:$0xff] }
 0x807   : > { %v3281_v50 = vmax.f32 %v3265_v29, 0.0  ;;  %v3266_v13 = vadd.f32 %v4486_v57, %v3249_v23  ;;  %v5997_v29 = vld [vmem:[#allocation6_spill] sm:$0xff]  ;;  %v5999_v23 = vld [vmem:[#allocation13_spill] sm:$0xff] }
 0x808   : > { %v3279_v11 = vmax.f32 %v3263_v45, 0.0  ;;  %v3264_v20 = vadd.f32 %v4487_v18, %v5810_v21  ;;  %v3543_v57 = vld [vmem:[%s5981_s11 + $0x10] sm:$0xff]  ;;  %v3404_v45 = vmul.f32 %v5999_v23, %v5834_v14  ;;  %v3544_v14 = vld [vmem:[%s5981_s11 + $0x18] sm:$0xff] }
 0x809   : > { %v5844_v12 = vadd.f32 %v3281_v50, %v5753_v26  ;;  %v3282_v41 = vmax.f32 %v3266_v13, 0.0 }
 0x80a   : > { %v5847_v59 = vadd.f32 %v3279_v11, %v5742_v24  ;;  %v3280_v51 = vmax.f32 %v3264_v20, 0.0  ;;  %v4446_v30 = vpop.f32.mrb[32].mxu0  ;;  %v6000_v11 = vld [vmem:[#allocation10_spill] sm:$0xff] }
 0x80b   : > { %v5850_v0 = vadd.f32 %v3282_v41, %v5747_v25  ;;  %v3253_v53 = vadd.f32 %v4446_v30, %v5768_v1  ;;  %v3075_v10 = vpop.f32.mrb[33].mxu0  ;;  %v3400_v1 = vmul.f32 %v5790_v36, %v3287_v32  ;;  %v5994_v32 = vld [vmem:[#allocation8_spill] sm:$0xff]  ;;  %v3403_v20 = vmul.f32 %v6000_v11, %v5821_v42 }
 0x80c   : > { %v5854_v6 = vadd.f32 %v3280_v51, %v5739_v62  ;;  %v3251_v21 = vadd.f32 %v5766_v48, %v3075_v10  ;;  %v4447_v34 = vpop.f32.mrb[34].mxu0  ;;  %v3545_v41 = vld [vmem:[%s5981_s11 + $0x20] sm:$0xff]  ;;  %v3406_v42 = vmul.f32 %v5826_v56, %v5831_v47  ;;  %v3546_v47 = vld [vmem:[%s5981_s11 + $0x28] sm:$0xff] }
 0x80d   : > { %v3269_v26 = vmax.f32 %v3253_v53, 0.0  ;;  %v3254_v46 = vadd.f32 %v4447_v34, %v5772_v28  ;;  %v3078_v9 = vpop.f32.mrb[35].mxu0  ;;  %v3513_v58 = vadd.f32 %v5994_v32, %v3400_v1  ;;  %v6001_v51 = vld [vmem:[#allocation9_spill] sm:$0xff]  ;;  %v6002_v1 = vld [vmem:[#allocation12_spill] sm:$0xff] }
 0x80e   : > { %v3267_v24 = vmax.f32 %v3251_v21, 0.0  ;;  %v3252_v3 = vadd.f32 %v5770_v27, %v3078_v9  ;;  %v3402_v27 = vmul.f32 %v5798_v54, %v5817_v38 }
 0x80f   : > { %v3285_v25 = vadd.f32 %v3269_v26, %v5678_v63  ;;  %v3270_v39 = vmax.f32 %v3254_v46, 0.0  ;;  %v3529_v13 = vmax.f32 %v3513_v58, 0.0  ;;  %v3492_v46 = vpop.permute.xlu0 %3491  ;;  %v3407_v58 = vmul.f32 %v5828_v8, %v5837_v7  ;;  %v3551_v8 = vld [vmem:[%s5981_s11 + $0x50] sm:$0xff] }
 0x810   : > { %v3283_v19 = vadd.f32 %v3267_v24, %v5660_v61  ;;  %v3268_v62 = vmax.f32 %v3252_v3, 0.0 }
 0x811   : > { %v3398_v16 = vmul.f32 %v5778_v33, %v3285_v25  ;;  %v3286_v48 = vadd.f32 %v3270_v39, %v5672_v52  ;;  %v3379_v33 = vpop.permute.xlu1 %3378  ;;  %v5995_v52 = vld [vmem:[#allocation7_spill] sm:$0xff]  ;;  %v3561_v3 = vmul.f32 %v3545_v41, %v3529_v13  ;;  %v3517_v39 = vadd.f32 %v5812_v43, %v3404_v45 }
 0x812   : > { %v3396_v60 = vmul.f32 %v5776_v31, %v3283_v19  ;;  %v3284_v28 = vadd.f32 %v3268_v62, %v5657_v44  ;;  %v3401_v31 = vmul.f32 %v5995_v52, %v5824_v4  ;;  %v3541_v44 = vld [vmem:[%s5981_s11] sm:$0xff]  ;;  %v3515_v4 = vadd.f32 %v5998_v22, %v3402_v27  ;;  %v3547_v25 = vld [vmem:[%s5981_s11 + $0x30] sm:$0xff] }
 0x813   : > { %v3399_v40 = vmul.f32 %v5784_v37, %v3286_v48  ;;  %v3511_v63 = vadd.f32 %v5786_v17, %v3398_v16  ;;  %v5996_v37 = vld [vmem:[#allocation5_spill] sm:$0xff]  ;;  %v3516_v19 = vadd.f32 %v6002_v1, %v3403_v20  ;;  %v6003_v62 = vld [vmem:[#allocation14_spill] sm:$0xff]  ;;  %v3408_v27 = vmul.f32 %v3379_v33, %v5847_v59  ;;  %v3548_v59 = vld [vmem:[%s5981_s11 + $0x38] sm:$0xff] }
 0x814   : > { %v3397_v36 = vmul.f32 %v5774_v2, %v3284_v28  ;;  %v3509_v61 = vadd.f32 %v5782_v5, %v3396_v60  ;;  %v3542_v5 = vld [vmem:[%s5981_s11 + $0x8] sm:$0xff]  ;;  %v3514_v30 = vadd.f32 %v6001_v51, %v3401_v31  ;;  %v3531_v9 = vmax.f32 %v3515_v4, 0.0  ;;  %v3552_v20 = vld [vmem:[%s5981_s11 + $0x58] sm:$0xff] }
 0x815   : > { %v3527_v17 = vmax.f32 %v3511_v63, 0.0  ;;  %v3512_v2 = vadd.f32 %v5997_v29, %v3399_v40  ;;  %v3384_v26 = vpop.permute.xlu1 %3383  ;;  %v3405_v16 = vmul.f32 %v6003_v62, %v5840_v15  ;;  %v3585_v43 = vsel %vm907_vm6, %v3561_v3, 0.0  ;;  %v3549_v15 = vld [vmem:[%s5981_s11 + $0x40] sm:$0xff] }
 0x816   : > { %v3525_v54 = vmax.f32 %v3509_v61, 0.0  ;;  %v3510_v38 = vadd.f32 %v5996_v37, %v3397_v36  ;;  %v3530_v28 = vmax.f32 %v3514_v30, 0.0  ;;  %v3563_v56 = vmul.f32 %v3547_v25, %v3531_v9  ;;  %v3497_v61 = vpop.permute.xlu0 %3496  ;;  %v3556_v25 = vld [vmem:[%s5981_s11 + $0x78] sm:$0xff] }
 0x817   : > { %v3559_v21 = vmul.f32 %v3543_v57, %v3527_v17  ;;  %v3528_v34 = vmax.f32 %v3512_v2, 0.0  ;;  %v3533_v40 = vmax.f32 %v3517_v39, 0.0  ;;  %v3519_v63 = vadd.f32 %v3482_v55, %v3406_v42 }
 0x818   : > { %v3557_v18 = vmul.f32 %v3541_v44, %v3525_v54  ;;  %v3526_v50 = vmax.f32 %v3510_v38, 0.0  ;;  %v3532_v32 = vmax.f32 %v3516_v19, 0.0  ;;  %v3562_v31 = vmul.f32 %v3546_v47, %v3530_v28 }
 0x819   : > { %v3579_v48 = vsel %vm907_vm6, %v3559_v21, 0.0  ;;  %v3560_v60 = vmul.f32 %v3544_v14, %v3528_v34  ;;  %v3389_v36 = vpop.permute.xlu1 %3388  ;;  %v3518_v55 = vadd.f32 %v5814_v35, %v3405_v16  ;;  %v3591_v33 = vsel %vm907_vm6, %v3563_v56, 0.0 }
 0x81a   : > { %v3573_v53 = vsel %vm907_vm6, %v3557_v18, 0.0  ;;  %v3558_v10 = vmul.f32 %v3542_v5, %v3526_v50  ;;  %v3410_v44 = vmul.f32 %v3389_v36, %v5844_v12  ;;  %v3565_v54 = vmul.f32 %v3549_v15, %v3533_v40  ;;  %v3502_v57 = vpop.permute.xlu0 %3501  ;;  %v3550_v12 = vld [vmem:[%s5981_s11 + $0x48] sm:$0xff]  ;;  %v3553_v18 = vld [vmem:[%s5981_s11 + $0x60] sm:$0xff] }
 0x81b   : > { %3574 = vadd.xlane.f32.xlu0 %v3573_v53  ;;  %v3582_v52 = vsel %vm907_vm6, %v3560_v60, 0.0  ;;  %v3535_v37 = vmax.f32 %v3519_v63, 0.0  ;;  %v3521_v38 = vadd.f32 %v3492_v46, %v3408_v27  ;;  %v3564_v17 = vmul.f32 %v3548_v59, %v3532_v32  ;;  %v3554_v46 = vld [vmem:[%s5981_s11 + $0x68] sm:$0xff] }
 0x81c   : > { %v3576_v24 = vsel %vm907_vm6, %v3558_v10, 0.0  ;;  %v3409_v7 = vmul.f32 %v3384_v26, %v5854_v6  ;;  %v3588_v29 = vsel %vm907_vm6, %v3562_v31, 0.0  ;;  %v3534_v2 = vmax.f32 %v3518_v55, 0.0  ;;  %v3555_v10 = vld [vmem:[%s5981_s11 + $0x70] sm:$0xff] }
 0x81d   : > { %3577 = vadd.xlane.f32.xlu1 %v3576_v24  ;;  %v3520_v35 = vadd.f32 %v5873_v49, %v3407_v58  ;;  %v3394_v5 = vpop.permute.xlu1 %3393  ;;  %v3597_v22 = vsel %vm907_vm6, %v3565_v54, 0.0  ;;  %v3567_v4 = vmul.f32 %v3551_v8, %v3535_v37  ;;  %v3537_v23 = vmax.f32 %v3521_v38, 0.0 }
 0x81e   : > { %v3523_v45 = vadd.f32 %v3502_v57, %v3410_v44  ;;  %v3594_v6 = vsel %vm907_vm6, %v3564_v17, 0.0  ;;  %v3411_v49 = vmul.f32 %v3394_v5, %v5850_v0  ;;  %v3566_v50 = vmul.f32 %v3550_v12, %v3534_v2 }
 0x81f   : > { %3580 = vadd.xlane.f32.xlu0 %v3579_v48  ;;  %v3536_v13 = vmax.f32 %v3520_v35, 0.0  ;;  %v3522_v11 = vadd.f32 %v3497_v61, %v3409_v7  ;;  %v3603_v41 = vsel %vm907_vm6, %v3567_v4, 0.0  ;;  %v3569_v51 = vmul.f32 %v3553_v18, %v3537_v23 }
 0x820   : > { %v3539_v30 = vmax.f32 %v3523_v45, 0.0  ;;  %v3600_v0 = vsel %vm907_vm6, %v3566_v50, 0.0  ;;  %v3642_v45 = vld [vmem:[#allocation4] sm:$0x1] }
 0x821   : > { %3586 = vadd.xlane.f32.xlu1 %v3585_v43  ;;  %v3507_v53 = vpop.permute.xlu1 %3506  ;;  %v3568_v21 = vmul.f32 %v3552_v20, %v3536_v13  ;;  %v3538_v34 = vmax.f32 %v3522_v11, 0.0  ;;  %v3609_v14 = vsel %vm907_vm6, %v3569_v51, 0.0 }
 0x822   : > { %v3524_v26 = vadd.f32 %v3507_v53, %v3411_v49  ;;  %v3571_v9 = vmul.f32 %v3555_v10, %v3539_v30  ;;  %v3649_v49 = vlaneseq }
 0x823   : > { %3583 = vadd.xlane.f32.xlu0 %v3582_v52  ;;  %v3606_v42 = vsel %vm907_vm6, %v3568_v21, 0.0  ;;  %v3570_v24 = vmul.f32 %v3554_v46, %v3538_v34 }
 0x824   : > { %v3540_v3 = vmax.f32 %v3524_v26, 0.0  ;;  %v3615_v39 = vsel %vm907_vm6, %v3571_v9, 0.0  ;;  %v3650_v50 = vshrl.u32 %v3649_v49, 7 }
 0x825   : > { %3592 = vadd.xlane.f32.xlu1 %v3591_v33  ;;  %v3612_v1 = vsel %vm907_vm6, %v3570_v24, 0.0 }
 0x826   : > { %v3572_v19 = vmul.f32 %v3556_v25, %v3540_v3  ;;  %v3651_v13 = vsub.s32 0, %v3650_v50 }
 0x827   : > { %3589 = vadd.xlane.f32.xlu0 %v3588_v29 }
 0x828   : > { %v3618_v62 = vsel %vm907_vm6, %v3572_v19, 0.0 }
 0x829   : > { %3598 = vadd.xlane.f32.xlu1 %v3597_v22 }
 0x82b   : > { %3595 = vadd.xlane.f32.xlu0 %v3594_v6 }
 0x82d   : > { %3604 = vadd.xlane.f32.xlu1 %v3603_v41 }
 0x82f   : > { %3601 = vadd.xlane.f32.xlu0 %v3600_v0 }
 0x831   : > { %3610 = vadd.xlane.f32.xlu1 %v3609_v14 }
 0x833   : > { %3607 = vadd.xlane.f32.xlu0 %v3606_v42 }
 0x835   : > { %3616 = vadd.xlane.f32.xlu1 %v3615_v39 }
 0x837   : > { %3613 = vadd.xlane.f32.xlu0 %v3612_v1 }
 0x83b   : > { %3619 = vadd.xlane.f32.xlu0 %v3618_v62 }
 0x8a8   : > { %v3575_v16 = vpop.xlane.xlu0 %3574 }
 0x8aa   : > { %v3578_v48 = vpop.xlane.xlu1 %3577 }
 0x8ab   : > { %v3621_v60 = vadd.f32 %v3578_v48, %v3575_v16 }
 0x8ac   : > { %v3581_v28 = vpop.xlane.xlu0 %3580 }
 0x8ad   : > { %v3622_v47 = vadd.f32 %v3621_v60, %v3581_v28 }
 0x8ae   : > { %v3587_v56 = vpop.xlane.xlu1 %3586 }
 0x8b0   : > { %v3584_v27 = vpop.xlane.xlu0 %3583 }
 0x8b1   : > { %v3623_v43 = vadd.f32 %v3622_v47, %v3584_v27 }
 0x8b2   : > { %v3593_v40 = vpop.xlane.xlu1 %3592 }
 0x8b3   : > { %v3624_v63 = vadd.f32 %v3623_v43, %v3587_v56 }
 0x8b4   : > { %v3590_v36 = vpop.xlane.xlu0 %3589 }
 0x8b5   : > { %v3625_v61 = vadd.f32 %v3624_v63, %v3590_v36 }
 0x8b6   : > { %v3599_v15 = vpop.xlane.xlu1 %3598 }
 0x8b7   : > { %v3626_v32 = vadd.f32 %v3625_v61, %v3593_v40 }
 0x8b8   : > { %v3596_v58 = vpop.xlane.xlu0 %3595 }
 0x8b9   : > { %v3627_v52 = vadd.f32 %v3626_v32, %v3596_v58 }
 0x8ba   : > { %v3605_v31 = vpop.xlane.xlu1 %3604 }
 0x8bb   : > { %v3628_v59 = vadd.f32 %v3627_v52, %v3599_v15 }
 0x8bc   : > { %v3602_v55 = vpop.xlane.xlu0 %3601 }
 0x8bd   : > { %v3629_v33 = vadd.f32 %v3628_v59, %v3602_v55 }
 0x8be   : > { %v3611_v54 = vpop.xlane.xlu1 %3610 }
 0x8bf   : > { %v3630_v44 = vadd.f32 %v3629_v33, %v3605_v31 }
 0x8c0   : > { %v3608_v37 = vpop.xlane.xlu0 %3607 }
 0x8c1   : > { %v3631_v38 = vadd.f32 %v3630_v44, %v3608_v37 }
 0x8c2   : > { %v3617_v29 = vpop.xlane.xlu1 %3616 }
 0x8c3   : > { %v3632_v17 = vadd.f32 %v3631_v38, %v3611_v54 }
 0x8c4   : > { %v3614_v8 = vpop.xlane.xlu0 %3613 }
 0x8c5   : > { %v3633_v7 = vadd.f32 %v3632_v17, %v3614_v8 }
 0x8c7   : > { %v3634_v2 = vadd.f32 %v3633_v7, %v3617_v29 }
 0x8c8   : > { %v3620_v35 = vpop.xlane.xlu0 %3619 }
 0x8c9   : > { %v3635_v5 = vadd.f32 %v3634_v2, %v3620_v35 }
 0x8cb   : > { %v3636_v57 = vrot.slane %v3635_v5, 4 }
 0x8cd   : > { %v3637_v12 = vadd.f32 %v3636_v57, %v3635_v5 }
 0x8cf   : > { %v3638_v22 = vrot.slane %v3637_v12, 2 }
 0x8d1   : > { %v3639_v4 = vadd.f32 %v3638_v22, %v3637_v12 }
 0x8d3   : > { %v3640_v23 = vrot.slane %v3639_v4, 1 }
 0x8d5   : > { %v3641_v6 = vadd.f32 %v3640_v23, %v3639_v4 }
 0x8d7   : > { %v3643_v18 = vadd.f32 %v3642_v45, %v3641_v6 }
 0x8d9   : > { %3646 = vperm.xlu1 %4573, %v3643_v18  }
 0x958   : > { %v3647_v11 = vpop.permute.xlu1 %3646 }
 0x959   : > { %v3652_v20 = vrot.slane %v3647_v11, %v3651_v13 }
 0x95b   : > { %3653 = vst [vmem:[%s452_s22] sm:$0x1] %v3652_v20 }
 0x95c PF: > { %s25_s27 = sadd.s32 1, %s4664_s27  }
 0x95d   : > { %p22_p4 = scmp.ge.s32.totalorder %s25_s27, 4  }
 0x95f   :  { %24 = sbr.rel (!%p22_p4) target bundleno = 3 (0x3), region = 119 }

</bundles_post_ra>
